<compile_context>
chip_gen: v7x
topology: tpu7x:2x2x1
jax: 0.10.0
libtpu: 0.0.40
codegen_flags: <defaults>
</compile_context>

<pallas_src>
import jax
import jax.numpy as jnp
from jax import lax
from jax.experimental import pallas as pl
from jax.experimental.pallas import tpu as pltpu


def _round_up(x, m):
    return (x + m - 1) // m * m


def timelstm_kernel(gx_ref, ts_ref, wd_w_ref, wd_b_ref, wall_w_ref,
                    out_ref, h_ref, c_ref):
    # grid = (batch_blocks ["parallel"], seq_blocks ["arbitrary"])
    @pl.when(pl.program_id(1) == 0)
    def _():
        h_ref[...] = jnp.zeros_like(h_ref)
        c_ref[...] = jnp.zeros_like(c_ref)

    T = out_ref.shape[0]          # timesteps in this grid step
    Hp = h_ref.shape[1]           # padded hidden (multiple of 128)

    # Weights/bias loaded once per grid step (constant-index blocks stay
    # resident across the whole sequence anyway).
    wd_w = wd_w_ref[...]
    wd_b = wd_b_ref[...]
    wall_w = wall_w_ref[...]
    mm_dtype = wd_w.dtype         # bf16 on v6e/v7x if requested; f32 otherwise

    def step(t, carry):
        h, c = carry                                   # (bb, Hp) f32
        gx = gx_ref[t]                                 # (bb, 4*Hp)  x-path + biases
        ts = ts_ref[t]                                 # (bb, 1)     1/log(t+e)

        # time-aware cell decomposition
        c_s1 = jnp.tanh(
            jnp.dot(c.astype(mm_dtype), wd_w,
                    preferred_element_type=jnp.float32) + wd_b)
        c_adj = (c - c_s1) + c_s1 * ts

        # gates: h @ W_all + (x @ U_all + b_U + b_W)   (x-path precomputed)
        gates = jnp.dot(h.astype(mm_dtype), wall_w,
                        preferred_element_type=jnp.float32) + gx

        f = jax.nn.sigmoid(gates[:, 0 * Hp:1 * Hp])
        i = jax.nn.sigmoid(gates[:, 1 * Hp:2 * Hp])
        o = jax.nn.sigmoid(gates[:, 2 * Hp:3 * Hp])
        # NOTE: candidate cell uses sigmoid (not tanh) -- matches the PyTorch
        # source exactly; do not "fix".
        c_tmp = jax.nn.sigmoid(gates[:, 3 * Hp:4 * Hp])

        c_new = f * c_adj + i * c_tmp
        h_new = o * jnp.tanh(c_new)

        out_ref[t] = h_new.astype(out_ref.dtype)
        return h_new, c_new

    h, c = lax.fori_loop(0, T, step, (h_ref[...], c_ref[...]), unroll=True)
    h_ref[...] = h
    c_ref[...] = c


def timelstm_forward(params, item_idx, mask, times, reverse=False,
                     seq_block=None, batch_block=None,
                     matmul_dtype=jnp.float32):
    # ---- glue (plain XLA) --------------------------------------------------
    # TODO(synk): the embedding gather + masked sum is a data-dependent gather
    # with no clean rectangular-DMA Pallas form at this size; kept in XLA.
    emb = params["emb"]
    x = (emb[item_idx] * mask[..., None]).sum(axis=2).astype(jnp.float32)
    b, seq, hid = x.shape

    # Hoist the input-path matmul out of the serial recurrence: one large
    # (b*seq, hid) x (hid, 4*hid) matmul with BOTH gate biases folded in.
    gx = (x.reshape(b * seq, hid) @ params["U_all_w"]
          + (params["U_all_b"] + params["W_all_b"])).reshape(b, seq, 4 * hid)

    # Precompute 1/log(t + 2.7183) once for the whole (b, seq) tensor.
    ts = 1.0 / jnp.log(times.astype(jnp.float32) + 2.7183)

    # ---- pad to the (8, 128) vreg tile -------------------------------------
    Hp = _round_up(hid, 128)
    Bp = _round_up(b, 8)
    if seq_block is None:
        seq_block = seq if seq <= 64 else 32
    Sp = _round_up(seq, seq_block)
    if batch_block is None:
        batch_block = Bp    # set to Bp // 2 to shard batch across v7x's 2 TCs
    nb = Bp // batch_block
    ns = Sp // seq_block

    # gates_x: pad PER GATE CHUNK so each gate slice is 128-lane aligned.
    gx4 = gx.reshape(b, seq, 4, hid)
    gx4 = jnp.pad(gx4, ((0, Bp - b), (0, Sp - seq), (0, 0), (0, Hp - hid)))
    gx_t = jnp.transpose(gx4.reshape(Bp, Sp, 4 * Hp), (1, 0, 2))  # (Sp,Bp,4Hp)

    ts_p = jnp.pad(ts, ((0, Bp - b), (0, Sp - seq)))
    ts_t = jnp.transpose(ts_p, (1, 0)).reshape(Sp, Bp, 1)         # (Sp,Bp,1)

    wd_w = jnp.pad(params["W_d_w"], ((0, Hp - hid), (0, Hp - hid)))
    wd_b = jnp.pad(params["W_d_b"], ((0, 0), (0, Hp - hid)))
    wall4 = params["W_all_w"].reshape(hid, 4, hid)
    wall_w = jnp.pad(wall4, ((0, Hp - hid), (0, 0),
                             (0, Hp - hid))).reshape(Hp, 4 * Hp)

    # bf16 weights double MXU throughput on v6e/v7x and halve weight VMEM
    # residency (matters at large hidden sizes on v7x's 64 MiB VMEM).
    wd_w = wd_w.astype(matmul_dtype)
    wall_w = wall_w.astype(matmul_dtype)

    grid_spec = pltpu.PrefetchScalarGridSpec(
        num_scalar_prefetch=0,
        grid=(nb, ns),
        in_specs=[
            pl.BlockSpec((seq_block, batch_block, 4 * Hp),
                         lambda bb, sb: (sb, bb, 0)),             # gates_x
            pl.BlockSpec((seq_block, batch_block, 1),
                         lambda bb, sb: (sb, bb, 0)),             # ts
            pl.BlockSpec((Hp, Hp), lambda bb, sb: (0, 0)),        # W_d weight
            pl.BlockSpec((1, Hp), lambda bb, sb: (0, 0)),         # W_d bias
            pl.BlockSpec((Hp, 4 * Hp), lambda bb, sb: (0, 0)),    # W_all weight
        ],
        out_specs=pl.BlockSpec((seq_block, batch_block, Hp),
                               lambda bb, sb: (sb, bb, 0)),
        scratch_shapes=[
            pltpu.VMEM((batch_block, Hp), jnp.float32),   # h carry
            pltpu.VMEM((batch_block, Hp), jnp.float32),   # c carry
        ],
    )

    out = pl.pallas_call(
        timelstm_kernel,
        out_shape=jax.ShapeDtypeStruct((Sp, Bp, Hp), jnp.float32),
        grid_spec=grid_spec,
        compiler_params=pltpu.CompilerParams(
            # batch blocks are independent (v7x megacore-shardable); the
            # sequence axis carries the recurrence and must stay sequential.
            dimension_semantics=("parallel", "arbitrary")),
    )(gx_t, ts_t, wd_w, wd_b, wall_w)

    out = jnp.transpose(out[:seq, :b, :hid], (1, 0, 2))   # (b, seq, hid)
    if reverse:
        out = jnp.flip(out, axis=1)
    return out


def timelstm_reference(params, item_idx, mask, times, reverse=False):
    """Pure-JAX reference mirroring the PyTorch forward exactly."""
    emb = params["emb"]
    x = (emb[item_idx] * mask[..., None]).sum(axis=2).astype(jnp.float32)
    b, seq, hid = x.shape
    ts = 1.0 / jnp.log(times.astype(jnp.float32) + 2.7183)   # (b, seq)
    h = jnp.zeros((b, hid), jnp.float32)
    c = jnp.zeros((b, hid), jnp.float32)
    outs = []
    for s in range(seq):
        c_s1 = jnp.tanh(c @ params["W_d_w"] + params["W_d_b"])
        c_s2 = c_s1 * ts[:, s:s + 1]
        c_adj = (c - c_s1) + c_s2
        gates = (h @ params["W_all_w"] + params["W_all_b"]
                 + x[:, s] @ params["U_all_w"] + params["U_all_b"])
        f, i, o, c_tmp = jnp.split(gates, 4, axis=1)
        f = jax.nn.sigmoid(f)
        i = jax.nn.sigmoid(i)
        o = jax.nn.sigmoid(o)
        c_tmp = jax.nn.sigmoid(c_tmp)
        c = f * c_adj + i * c_tmp
        h = o * jnp.tanh(c)
        outs.append(h)
    out = jnp.stack(outs, axis=1)
    if reverse:
        out = jnp.flip(out, axis=1)
    return out


def init_params(key, input_size, hidden_size):
    # Deterministic synthetic init (module shapes; W_all(h) is usable only
    # when input_size == hidden_size, exactly as in the original forward()).
    ks = jax.random.split(key, 7)
    sc_in = 1.0 / jnp.sqrt(jnp.float32(input_size))
    sc_hid = 1.0 / jnp.sqrt(jnp.float32(hidden_size))
    emb = jax.random.normal(ks[0], (input_size + 1, hidden_size), jnp.float32) * 0.1
    emb = emb.at[input_size].set(0.0)   # padding_idx = input_size
    params = {
        "emb": emb,
        # stored transposed vs torch Linear.weight: (in, out)
        "W_all_w": jax.random.uniform(ks[1], (input_size, hidden_size * 4),
                                      jnp.float32, -sc_in, sc_in),
        "W_all_b": jax.random.uniform(ks[2], (1, hidden_size * 4),
                                      jnp.float32, -sc_in, sc_in),
        "U_all_w": jax.random.uniform(ks[3], (hidden_size, hidden_size * 4),
                                      jnp.float32, -sc_hid, sc_hid),
        "U_all_b": jax.random.uniform(ks[4], (1, hidden_size * 4),
                                      jnp.float32, -sc_hid, sc_hid),
        "W_d_w": jax.random.uniform(ks[5], (hidden_size, hidden_size),
                                    jnp.float32, -sc_hid, sc_hid),
        "W_d_b": jax.random.uniform(ks[6], (1, hidden_size),
                                    jnp.float32, -sc_hid, sc_hid),
    }
    return params


if __name__ == "__main__":
    # small shapes: batch=4, seq=8, items-per-step=5, hidden=input=32
    b, seq, n_items = 4, 8, 5
    input_size = 32
    hidden_size = 32   # W_all(h) requires input_size == hidden_size (as in source)

    key = jax.random.PRNGKey(0)
    kp, k_idx, k_mask, k_t = jax.random.split(key, 4)

    params = init_params(kp, input_size, hidden_size)

    # inputs_list[0]: item indices (b, seq, n_items), padding index == input_size
    item_idx = jax.random.randint(k_idx, (b, seq, n_items), 0, input_size + 1,
                                  dtype=jnp.int32)
    # inputs_list[1]: mask (b, seq, n_items)
    mask = (jax.random.uniform(k_mask, (b, seq, n_items)) > 0.3).astype(jnp.float32)
    # inputs_list[2]: timestamps (b, seq), positive
    times = jax.random.uniform(k_t, (b, seq), jnp.float32, 0.5, 10.0)

    out = timelstm_forward(params, item_idx, mask, times)
    out = jax.block_until_ready(out)

    ref = timelstm_reference(params, item_idx, mask, times)
    ref = jax.block_until_ready(ref)

    assert out.shape == (b, seq, hidden_size)
    assert jnp.allclose(out, ref, rtol=1e-4, atol=1e-4), "mismatch vs reference"

    print("KERNEL_OK")
</pallas_src>

<mosaic_0001>
module attributes {stable_mosaic.version = 11 : i64} {
  func.func @timelstm_kernel(%arg0: i32, %arg1: i32, %arg2: memref<8x8x512xf32, #tpu.memory_space<vmem>>, %arg3: memref<8x8x1xf32, #tpu.memory_space<vmem>>, %arg4: memref<128x128xf32, #tpu.memory_space<vmem>>, %arg5: memref<1x128xf32, #tpu.memory_space<vmem>>, %arg6: memref<128x512xf32, #tpu.memory_space<vmem>>, %arg7: memref<8x8x128xf32, #tpu.memory_space<vmem>>, %arg8: memref<8x128xf32, #tpu.memory_space<vmem>>, %arg9: memref<8x128xf32, #tpu.memory_space<vmem>>) attributes {dimension_semantics = [#tpu.dimension_semantics<parallel>, #tpu.dimension_semantics<arbitrary>], iteration_bounds = array<i64: 1, 1>, scalar_prefetch = 0 : i64, scratch_operands = 2 : i64, tpu.core_type = #tpu.core_type<tc>, window_params = [{transform_indices = @transform_0, window_bounds = array<i64: 8, 8, 512>}, {transform_indices = @transform_1, window_bounds = array<i64: 8, 8, 1>}, {pipeline_mode = #tpu.pipeline_mode<synchronous>, transform_indices = @transform_2, window_bounds = array<i64: 128, 128>}, {pipeline_mode = #tpu.pipeline_mode<synchronous>, transform_indices = @transform_3, window_bounds = array<i64: 1, 128>}, {pipeline_mode = #tpu.pipeline_mode<synchronous>, transform_indices = @transform_4, window_bounds = array<i64: 128, 512>}, {transform_indices = @transform_5, window_bounds = array<i64: 8, 8, 128>}]} {
    %c0_i32 = arith.constant 0 : i32
    %0 = arith.cmpi eq, %arg1, %c0_i32 : i32
    %1 = arith.extui %0 : i1 to i32
    %c0_i32_0 = arith.constant 0 : i32
    %2 = arith.cmpi ne, %1, %c0_i32_0 : i32
    scf.if %2 {
      %cst_110 = arith.constant 0.000000e+00 : f32
      %402 = vector.broadcast %cst_110 : f32 to vector<8x128xf32>
      %c0_111 = arith.constant 0 : index
      %c0_112 = arith.constant 0 : index
      %403 = vector.load %arg8[%c0_111, %c0_112] : memref<8x128xf32, #tpu.memory_space<vmem>>, vector<8x128xf32>
      tpu.vector_store %arg8[%c0_111, %c0_112], %402 {strides = array<i32>} : memref<8x128xf32, #tpu.memory_space<vmem>>, vector<8x128xf32>,
      %cst_113 = arith.constant 0.000000e+00 : f32
      %404 = vector.broadcast %cst_113 : f32 to vector<8x128xf32>
      %c0_114 = arith.constant 0 : index
      %c0_115 = arith.constant 0 : index
      %405 = vector.load %arg9[%c0_114, %c0_115] : memref<8x128xf32, #tpu.memory_space<vmem>>, vector<8x128xf32>
      tpu.vector_store %arg9[%c0_114, %c0_115], %404 {strides = array<i32>} : memref<8x128xf32, #tpu.memory_space<vmem>>, vector<8x128xf32>,
    } else {
    }
    %c0 = arith.constant 0 : index
    %c0_1 = arith.constant 0 : index
    %3 = vector.load %arg4[%c0, %c0_1] : memref<128x128xf32, #tpu.memory_space<vmem>>, vector<128x128xf32>
    %c0_2 = arith.constant 0 : index
    %c0_3 = arith.constant 0 : index
    %4 = vector.load %arg5[%c0_2, %c0_3] : memref<1x128xf32, #tpu.memory_space<vmem>>, vector<1x128xf32>
    %c0_4 = arith.constant 0 : index
    %c0_5 = arith.constant 0 : index
    %5 = vector.load %arg6[%c0_4, %c0_5] : memref<128x512xf32, #tpu.memory_space<vmem>>, vector<128x512xf32>
    %c0_6 = arith.constant 0 : index
    %c0_7 = arith.constant 0 : index
    %6 = vector.load %arg8[%c0_6, %c0_7] : memref<8x128xf32, #tpu.memory_space<vmem>>, vector<8x128xf32>
    %c0_8 = arith.constant 0 : index
    %c0_9 = arith.constant 0 : index
    %7 = vector.load %arg9[%c0_8, %c0_9] : memref<8x128xf32, #tpu.memory_space<vmem>>, vector<8x128xf32>
    %c0_i32_10 = arith.constant 0 : i32
    %8 = arith.index_cast %c0_i32_10 : i32 to index
    %c0_11 = arith.constant 0 : index
    %c0_12 = arith.constant 0 : index
    %9 = vector.load %arg2[%8, %c0_11, %c0_12] : memref<8x8x512xf32, #tpu.memory_space<vmem>>, vector<1x8x512xf32>
    %10 = vector.shape_cast %9 : vector<1x8x512xf32> to vector<8x512xf32>
    %11 = arith.index_cast %c0_i32_10 : i32 to index
    %c0_13 = arith.constant 0 : index
    %c0_14 = arith.constant 0 : index
    %12 = vector.load %arg3[%11, %c0_13, %c0_14] : memref<8x8x1xf32, #tpu.memory_space<vmem>>, vector<1x8x1xf32>
    %13 = vector.shape_cast %12 : vector<1x8x1xf32> to vector<8x1xf32>
    %cst = arith.constant dense<0.000000e+00> : vector<8x128xf32>
    %14 = tpu.matmul %7, %3, %cst {dimension_numbers = #tpu.dot_dimension_numbers<[1], [0], [0], [1], [0, 0, 1, 1], [], []>} : vector<8x128xf32>, vector<128x128xf32>, vector<8x128xf32> -> vector<8x128xf32>
    %15 = vector.broadcast %4 : vector<1x128xf32> to vector<8x128xf32>
    %16 = arith.addf %14, %15 : vector<8x128xf32>
    %17 = math.tanh %16 : vector<8x128xf32>
    %18 = arith.subf %7, %17 : vector<8x128xf32>
    %19 = vector.broadcast %13 : vector<8x1xf32> to vector<8x128xf32>
    %20 = arith.mulf %17, %19 : vector<8x128xf32>
    %21 = arith.addf %18, %20 : vector<8x128xf32>
    %cst_15 = arith.constant dense<0.000000e+00> : vector<8x512xf32>
    %22 = tpu.matmul %6, %5, %cst_15 {dimension_numbers = #tpu.dot_dimension_numbers<[1], [0], [0], [1], [0, 0, 1, 1], [], []>} : vector<8x128xf32>, vector<128x512xf32>, vector<8x512xf32> -> vector<8x512xf32>
    %23 = arith.addf %22, %10 : vector<8x512xf32>
    %24 = vector.extract_strided_slice %23 {offsets = [0, 0], sizes = [8, 128], strides = [1, 1]} : vector<8x512xf32> to vector<8x128xf32>
    %25 = arith.negf %24 : vector<8x128xf32>
    %26 = math.exp %25 : vector<8x128xf32>
    %cst_16 = arith.constant 1.000000e+00 : f32
    %27 = vector.broadcast %cst_16 : f32 to vector<8x128xf32>
    %28 = arith.addf %27, %26 : vector<8x128xf32>
    %29 = arith.divf %27, %28 : vector<8x128xf32>
    %30 = vector.extract_strided_slice %23 {offsets = [0, 128], sizes = [8, 128], strides = [1, 1]} : vector<8x512xf32> to vector<8x128xf32>
    %31 = arith.negf %30 : vector<8x128xf32>
    %32 = math.exp %31 : vector<8x128xf32>
    %cst_17 = arith.constant 1.000000e+00 : f32
    %33 = vector.broadcast %cst_17 : f32 to vector<8x128xf32>
    %34 = arith.addf %33, %32 : vector<8x128xf32>
    %35 = arith.divf %33, %34 : vector<8x128xf32>
    %36 = vector.extract_strided_slice %23 {offsets = [0, 256], sizes = [8, 128], strides = [1, 1]} : vector<8x512xf32> to vector<8x128xf32>
    %37 = arith.negf %36 : vector<8x128xf32>
    %38 = math.exp %37 : vector<8x128xf32>
    %cst_18 = arith.constant 1.000000e+00 : f32
    %39 = vector.broadcast %cst_18 : f32 to vector<8x128xf32>
    %40 = arith.addf %39, %38 : vector<8x128xf32>
    %41 = arith.divf %39, %40 : vector<8x128xf32>
    %42 = vector.extract_strided_slice %23 {offsets = [0, 384], sizes = [8, 128], strides = [1, 1]} : vector<8x512xf32> to vector<8x128xf32>
    %43 = arith.negf %42 : vector<8x128xf32>
    %44 = math.exp %43 : vector<8x128xf32>
    %cst_19 = arith.constant 1.000000e+00 : f32
    %45 = vector.broadcast %cst_19 : f32 to vector<8x128xf32>
    %46 = arith.addf %45, %44 : vector<8x128xf32>
    %47 = arith.divf %45, %46 : vector<8x128xf32>
    %48 = arith.mulf %29, %21 : vector<8x128xf32>
    %49 = arith.mulf %35, %47 : vector<8x128xf32>
    %50 = arith.addf %48, %49 : vector<8x128xf32>
    %51 = math.tanh %50 : vector<8x128xf32>
    %52 = arith.mulf %41, %51 : vector<8x128xf32>
    %53 = arith.index_cast %c0_i32_10 : i32 to index
    %c0_20 = arith.constant 0 : index
    %c0_21 = arith.constant 0 : index
    %54 = vector.load %arg7[%53, %c0_20, %c0_21] : memref<8x8x128xf32, #tpu.memory_space<vmem>>, vector<1x8x128xf32>
    %55 = vector.shape_cast %54 : vector<1x8x128xf32> to vector<8x128xf32>
    %56 = vector.shape_cast %52 : vector<8x128xf32> to vector<1x8x128xf32>
    tpu.vector_store %arg7[%53, %c0_20, %c0_21], %56 {strides = array<i32>} : memref<8x8x128xf32, #tpu.memory_space<vmem>>, vector<1x8x128xf32>,
    %c1_i32 = arith.constant 1 : i32
    %57 = arith.index_cast %c1_i32 : i32 to index
    %c0_22 = arith.constant 0 : index
    %c0_23 = arith.constant 0 : index
    %58 = vector.load %arg2[%57, %c0_22, %c0_23] : memref<8x8x512xf32, #tpu.memory_space<vmem>>, vector<1x8x512xf32>
    %59 = vector.shape_cast %58 : vector<1x8x512xf32> to vector<8x512xf32>
    %60 = arith.index_cast %c1_i32 : i32 to index
    %c0_24 = arith.constant 0 : index
    %c0_25 = arith.constant 0 : index
    %61 = vector.load %arg3[%60, %c0_24, %c0_25] : memref<8x8x1xf32, #tpu.memory_space<vmem>>, vector<1x8x1xf32>
    %62 = vector.shape_cast %61 : vector<1x8x1xf32> to vector<8x1xf32>
    %cst_26 = arith.constant dense<0.000000e+00> : vector<8x128xf32>
    %63 = tpu.matmul %50, %3, %cst_26 {dimension_numbers = #tpu.dot_dimension_numbers<[1], [0], [0], [1], [0, 0, 1, 1], [], []>} : vector<8x128xf32>, vector<128x128xf32>, vector<8x128xf32> -> vector<8x128xf32>
    %64 = vector.broadcast %4 : vector<1x128xf32> to vector<8x128xf32>
    %65 = arith.addf %63, %64 : vector<8x128xf32>
    %66 = math.tanh %65 : vector<8x128xf32>
    %67 = arith.subf %50, %66 : vector<8x128xf32>
    %68 = vector.broadcast %62 : vector<8x1xf32> to vector<8x128xf32>
    %69 = arith.mulf %66, %68 : vector<8x128xf32>
    %70 = arith.addf %67, %69 : vector<8x128xf32>
    %cst_27 = arith.constant dense<0.000000e+00> : vector<8x512xf32>
    %71 = tpu.matmul %52, %5, %cst_27 {dimension_numbers = #tpu.dot_dimension_numbers<[1], [0], [0], [1], [0, 0, 1, 1], [], []>} : vector<8x128xf32>, vector<128x512xf32>, vector<8x512xf32> -> vector<8x512xf32>
    %72 = arith.addf %71, %59 : vector<8x512xf32>
    %73 = vector.extract_strided_slice %72 {offsets = [0, 0], sizes = [8, 128], strides = [1, 1]} : vector<8x512xf32> to vector<8x128xf32>
    %74 = arith.negf %73 : vector<8x128xf32>
    %75 = math.exp %74 : vector<8x128xf32>
    %cst_28 = arith.constant 1.000000e+00 : f32
    %76 = vector.broadcast %cst_28 : f32 to vector<8x128xf32>
    %77 = arith.addf %76, %75 : vector<8x128xf32>
    %78 = arith.divf %76, %77 : vector<8x128xf32>
    %79 = vector.extract_strided_slice %72 {offsets = [0, 128], sizes = [8, 128], strides = [1, 1]} : vector<8x512xf32> to vector<8x128xf32>
    %80 = arith.negf %79 : vector<8x128xf32>
    %81 = math.exp %80 : vector<8x128xf32>
    %cst_29 = arith.constant 1.000000e+00 : f32
    %82 = vector.broadcast %cst_29 : f32 to vector<8x128xf32>
    %83 = arith.addf %82, %81 : vector<8x128xf32>
    %84 = arith.divf %82, %83 : vector<8x128xf32>
    %85 = vector.extract_strided_slice %72 {offsets = [0, 256], sizes = [8, 128], strides = [1, 1]} : vector<8x512xf32> to vector<8x128xf32>
    %86 = arith.negf %85 : vector<8x128xf32>
    %87 = math.exp %86 : vector<8x128xf32>
    %cst_30 = arith.constant 1.000000e+00 : f32
    %88 = vector.broadcast %cst_30 : f32 to vector<8x128xf32>
    %89 = arith.addf %88, %87 : vector<8x128xf32>
    %90 = arith.divf %88, %89 : vector<8x128xf32>
    %91 = vector.extract_strided_slice %72 {offsets = [0, 384], sizes = [8, 128], strides = [1, 1]} : vector<8x512xf32> to vector<8x128xf32>
    %92 = arith.negf %91 : vector<8x128xf32>
    %93 = math.exp %92 : vector<8x128xf32>
    %cst_31 = arith.constant 1.000000e+00 : f32
    %94 = vector.broadcast %cst_31 : f32 to vector<8x128xf32>
    %95 = arith.addf %94, %93 : vector<8x128xf32>
    %96 = arith.divf %94, %95 : vector<8x128xf32>
    %97 = arith.mulf %78, %70 : vector<8x128xf32>
    %98 = arith.mulf %84, %96 : vector<8x128xf32>
    %99 = arith.addf %97, %98 : vector<8x128xf32>
    %100 = math.tanh %99 : vector<8x128xf32>
    %101 = arith.mulf %90, %100 : vector<8x128xf32>
    %102 = arith.index_cast %c1_i32 : i32 to index
    %c0_32 = arith.constant 0 : index
    %c0_33 = arith.constant 0 : index
    %103 = vector.load %arg7[%102, %c0_32, %c0_33] : memref<8x8x128xf32, #tpu.memory_space<vmem>>, vector<1x8x128xf32>
    %104 = vector.shape_cast %103 : vector<1x8x128xf32> to vector<8x128xf32>
    %105 = vector.shape_cast %101 : vector<8x128xf32> to vector<1x8x128xf32>
    tpu.vector_store %arg7[%102, %c0_32, %c0_33], %105 {strides = array<i32>} : memref<8x8x128xf32, #tpu.memory_space<vmem>>, vector<1x8x128xf32>,
    %c2_i32 = arith.constant 2 : i32
    %106 = arith.index_cast %c2_i32 : i32 to index
    %c0_34 = arith.constant 0 : index
    %c0_35 = arith.constant 0 : index
    %107 = vector.load %arg2[%106, %c0_34, %c0_35] : memref<8x8x512xf32, #tpu.memory_space<vmem>>, vector<1x8x512xf32>
    %108 = vector.shape_cast %107 : vector<1x8x512xf32> to vector<8x512xf32>
    %109 = arith.index_cast %c2_i32 : i32 to index
    %c0_36 = arith.constant 0 : index
    %c0_37 = arith.constant 0 : index
    %110 = vector.load %arg3[%109, %c0_36, %c0_37] : memref<8x8x1xf32, #tpu.memory_space<vmem>>, vector<1x8x1xf32>
    %111 = vector.shape_cast %110 : vector<1x8x1xf32> to vector<8x1xf32>
    %cst_38 = arith.constant dense<0.000000e+00> : vector<8x128xf32>
    %112 = tpu.matmul %99, %3, %cst_38 {dimension_numbers = #tpu.dot_dimension_numbers<[1], [0], [0], [1], [0, 0, 1, 1], [], []>} : vector<8x128xf32>, vector<128x128xf32>, vector<8x128xf32> -> vector<8x128xf32>
    %113 = vector.broadcast %4 : vector<1x128xf32> to vector<8x128xf32>
    %114 = arith.addf %112, %113 : vector<8x128xf32>
    %115 = math.tanh %114 : vector<8x128xf32>
    %116 = arith.subf %99, %115 : vector<8x128xf32>
    %117 = vector.broadcast %111 : vector<8x1xf32> to vector<8x128xf32>
    %118 = arith.mulf %115, %117 : vector<8x128xf32>
    %119 = arith.addf %116, %118 : vector<8x128xf32>
    %cst_39 = arith.constant dense<0.000000e+00> : vector<8x512xf32>
    %120 = tpu.matmul %101, %5, %cst_39 {dimension_numbers = #tpu.dot_dimension_numbers<[1], [0], [0], [1], [0, 0, 1, 1], [], []>} : vector<8x128xf32>, vector<128x512xf32>, vector<8x512xf32> -> vector<8x512xf32>
    %121 = arith.addf %120, %108 : vector<8x512xf32>
    %122 = vector.extract_strided_slice %121 {offsets = [0, 0], sizes = [8, 128], strides = [1, 1]} : vector<8x512xf32> to vector<8x128xf32>
    %123 = arith.negf %122 : vector<8x128xf32>
    %124 = math.exp %123 : vector<8x128xf32>
    %cst_40 = arith.constant 1.000000e+00 : f32
    %125 = vector.broadcast %cst_40 : f32 to vector<8x128xf32>
    %126 = arith.addf %125, %124 : vector<8x128xf32>
    %127 = arith.divf %125, %126 : vector<8x128xf32>
    %128 = vector.extract_strided_slice %121 {offsets = [0, 128], sizes = [8, 128], strides = [1, 1]} : vector<8x512xf32> to vector<8x128xf32>
    %129 = arith.negf %128 : vector<8x128xf32>
    %130 = math.exp %129 : vector<8x128xf32>
    %cst_41 = arith.constant 1.000000e+00 : f32
    %131 = vector.broadcast %cst_41 : f32 to vector<8x128xf32>
    %132 = arith.addf %131, %130 : vector<8x128xf32>
    %133 = arith.divf %131, %132 : vector<8x128xf32>
    %134 = vector.extract_strided_slice %121 {offsets = [0, 256], sizes = [8, 128], strides = [1, 1]} : vector<8x512xf32> to vector<8x128xf32>
    %135 = arith.negf %134 : vector<8x128xf32>
    %136 = math.exp %135 : vector<8x128xf32>
    %cst_42 = arith.constant 1.000000e+00 : f32
    %137 = vector.broadcast %cst_42 : f32 to vector<8x128xf32>
    %138 = arith.addf %137, %136 : vector<8x128xf32>
    %139 = arith.divf %137, %138 : vector<8x128xf32>
    %140 = vector.extract_strided_slice %121 {offsets = [0, 384], sizes = [8, 128], strides = [1, 1]} : vector<8x512xf32> to vector<8x128xf32>
    %141 = arith.negf %140 : vector<8x128xf32>
    %142 = math.exp %141 : vector<8x128xf32>
    %cst_43 = arith.constant 1.000000e+00 : f32
    %143 = vector.broadcast %cst_43 : f32 to vector<8x128xf32>
    %144 = arith.addf %143, %142 : vector<8x128xf32>
    %145 = arith.divf %143, %144 : vector<8x128xf32>
    %146 = arith.mulf %127, %119 : vector<8x128xf32>
    %147 = arith.mulf %133, %145 : vector<8x128xf32>
    %148 = arith.addf %146, %147 : vector<8x128xf32>
    %149 = math.tanh %148 : vector<8x128xf32>
    %150 = arith.mulf %139, %149 : vector<8x128xf32>
    %151 = arith.index_cast %c2_i32 : i32 to index
    %c0_44 = arith.constant 0 : index
    %c0_45 = arith.constant 0 : index
    %152 = vector.load %arg7[%151, %c0_44, %c0_45] : memref<8x8x128xf32, #tpu.memory_space<vmem>>, vector<1x8x128xf32>
    %153 = vector.shape_cast %152 : vector<1x8x128xf32> to vector<8x128xf32>
    %154 = vector.shape_cast %150 : vector<8x128xf32> to vector<1x8x128xf32>
    tpu.vector_store %arg7[%151, %c0_44, %c0_45], %154 {strides = array<i32>} : memref<8x8x128xf32, #tpu.memory_space<vmem>>, vector<1x8x128xf32>,
    %c3_i32 = arith.constant 3 : i32
    %155 = arith.index_cast %c3_i32 : i32 to index
    %c0_46 = arith.constant 0 : index
    %c0_47 = arith.constant 0 : index
    %156 = vector.load %arg2[%155, %c0_46, %c0_47] : memref<8x8x512xf32, #tpu.memory_space<vmem>>, vector<1x8x512xf32>
    %157 = vector.shape_cast %156 : vector<1x8x512xf32> to vector<8x512xf32>
    %158 = arith.index_cast %c3_i32 : i32 to index
    %c0_48 = arith.constant 0 : index
    %c0_49 = arith.constant 0 : index
    %159 = vector.load %arg3[%158, %c0_48, %c0_49] : memref<8x8x1xf32, #tpu.memory_space<vmem>>, vector<1x8x1xf32>
    %160 = vector.shape_cast %159 : vector<1x8x1xf32> to vector<8x1xf32>
    %cst_50 = arith.constant dense<0.000000e+00> : vector<8x128xf32>
    %161 = tpu.matmul %148, %3, %cst_50 {dimension_numbers = #tpu.dot_dimension_numbers<[1], [0], [0], [1], [0, 0, 1, 1], [], []>} : vector<8x128xf32>, vector<128x128xf32>, vector<8x128xf32> -> vector<8x128xf32>
    %162 = vector.broadcast %4 : vector<1x128xf32> to vector<8x128xf32>
    %163 = arith.addf %161, %162 : vector<8x128xf32>
    %164 = math.tanh %163 : vector<8x128xf32>
    %165 = arith.subf %148, %164 : vector<8x128xf32>
    %166 = vector.broadcast %160 : vector<8x1xf32> to vector<8x128xf32>
    %167 = arith.mulf %164, %166 : vector<8x128xf32>
    %168 = arith.addf %165, %167 : vector<8x128xf32>
    %cst_51 = arith.constant dense<0.000000e+00> : vector<8x512xf32>
    %169 = tpu.matmul %150, %5, %cst_51 {dimension_numbers = #tpu.dot_dimension_numbers<[1], [0], [0], [1], [0, 0, 1, 1], [], []>} : vector<8x128xf32>, vector<128x512xf32>, vector<8x512xf32> -> vector<8x512xf32>
    %170 = arith.addf %169, %157 : vector<8x512xf32>
    %171 = vector.extract_strided_slice %170 {offsets = [0, 0], sizes = [8, 128], strides = [1, 1]} : vector<8x512xf32> to vector<8x128xf32>
    %172 = arith.negf %171 : vector<8x128xf32>
    %173 = math.exp %172 : vector<8x128xf32>
    %cst_52 = arith.constant 1.000000e+00 : f32
    %174 = vector.broadcast %cst_52 : f32 to vector<8x128xf32>
    %175 = arith.addf %174, %173 : vector<8x128xf32>
    %176 = arith.divf %174, %175 : vector<8x128xf32>
    %177 = vector.extract_strided_slice %170 {offsets = [0, 128], sizes = [8, 128], strides = [1, 1]} : vector<8x512xf32> to vector<8x128xf32>
    %178 = arith.negf %177 : vector<8x128xf32>
    %179 = math.exp %178 : vector<8x128xf32>
    %cst_53 = arith.constant 1.000000e+00 : f32
    %180 = vector.broadcast %cst_53 : f32 to vector<8x128xf32>
    %181 = arith.addf %180, %179 : vector<8x128xf32>
    %182 = arith.divf %180, %181 : vector<8x128xf32>
    %183 = vector.extract_strided_slice %170 {offsets = [0, 256], sizes = [8, 128], strides = [1, 1]} : vector<8x512xf32> to vector<8x128xf32>
    %184 = arith.negf %183 : vector<8x128xf32>
    %185 = math.exp %184 : vector<8x128xf32>
    %cst_54 = arith.constant 1.000000e+00 : f32
    %186 = vector.broadcast %cst_54 : f32 to vector<8x128xf32>
    %187 = arith.addf %186, %185 : vector<8x128xf32>
    %188 = arith.divf %186, %187 : vector<8x128xf32>
    %189 = vector.extract_strided_slice %170 {offsets = [0, 384], sizes = [8, 128], strides = [1, 1]} : vector<8x512xf32> to vector<8x128xf32>
    %190 = arith.negf %189 : vector<8x128xf32>
    %191 = math.exp %190 : vector<8x128xf32>
    %cst_55 = arith.constant 1.000000e+00 : f32
    %192 = vector.broadcast %cst_55 : f32 to vector<8x128xf32>
    %193 = arith.addf %192, %191 : vector<8x128xf32>
    %194 = arith.divf %192, %193 : vector<8x128xf32>
    %195 = arith.mulf %176, %168 : vector<8x128xf32>
    %196 = arith.mulf %182, %194 : vector<8x128xf32>
    %197 = arith.addf %195, %196 : vector<8x128xf32>
    %198 = math.tanh %197 : vector<8x128xf32>
    %199 = arith.mulf %188, %198 : vector<8x128xf32>
    %200 = arith.index_cast %c3_i32 : i32 to index
    %c0_56 = arith.constant 0 : index
    %c0_57 = arith.constant 0 : index
    %201 = vector.load %arg7[%200, %c0_56, %c0_57] : memref<8x8x128xf32, #tpu.memory_space<vmem>>, vector<1x8x128xf32>
    %202 = vector.shape_cast %201 : vector<1x8x128xf32> to vector<8x128xf32>
    %203 = vector.shape_cast %199 : vector<8x128xf32> to vector<1x8x128xf32>
    tpu.vector_store %arg7[%200, %c0_56, %c0_57], %203 {strides = array<i32>} : memref<8x8x128xf32, #tpu.memory_space<vmem>>, vector<1x8x128xf32>,
    %c4_i32 = arith.constant 4 : i32
    %204 = arith.index_cast %c4_i32 : i32 to index
    %c0_58 = arith.constant 0 : index
    %c0_59 = arith.constant 0 : index
    %205 = vector.load %arg2[%204, %c0_58, %c0_59] : memref<8x8x512xf32, #tpu.memory_space<vmem>>, vector<1x8x512xf32>
    %206 = vector.shape_cast %205 : vector<1x8x512xf32> to vector<8x512xf32>
    %207 = arith.index_cast %c4_i32 : i32 to index
    %c0_60 = arith.constant 0 : index
    %c0_61 = arith.constant 0 : index
    %208 = vector.load %arg3[%207, %c0_60, %c0_61] : memref<8x8x1xf32, #tpu.memory_space<vmem>>, vector<1x8x1xf32>
    %209 = vector.shape_cast %208 : vector<1x8x1xf32> to vector<8x1xf32>
    %cst_62 = arith.constant dense<0.000000e+00> : vector<8x128xf32>
    %210 = tpu.matmul %197, %3, %cst_62 {dimension_numbers = #tpu.dot_dimension_numbers<[1], [0], [0], [1], [0, 0, 1, 1], [], []>} : vector<8x128xf32>, vector<128x128xf32>, vector<8x128xf32> -> vector<8x128xf32>
    %211 = vector.broadcast %4 : vector<1x128xf32> to vector<8x128xf32>
    %212 = arith.addf %210, %211 : vector<8x128xf32>
    %213 = math.tanh %212 : vector<8x128xf32>
    %214 = arith.subf %197, %213 : vector<8x128xf32>
    %215 = vector.broadcast %209 : vector<8x1xf32> to vector<8x128xf32>
    %216 = arith.mulf %213, %215 : vector<8x128xf32>
    %217 = arith.addf %214, %216 : vector<8x128xf32>
    %cst_63 = arith.constant dense<0.000000e+00> : vector<8x512xf32>
    %218 = tpu.matmul %199, %5, %cst_63 {dimension_numbers = #tpu.dot_dimension_numbers<[1], [0], [0], [1], [0, 0, 1, 1], [], []>} : vector<8x128xf32>, vector<128x512xf32>, vector<8x512xf32> -> vector<8x512xf32>
    %219 = arith.addf %218, %206 : vector<8x512xf32>
    %220 = vector.extract_strided_slice %219 {offsets = [0, 0], sizes = [8, 128], strides = [1, 1]} : vector<8x512xf32> to vector<8x128xf32>
    %221 = arith.negf %220 : vector<8x128xf32>
    %222 = math.exp %221 : vector<8x128xf32>
    %cst_64 = arith.constant 1.000000e+00 : f32
    %223 = vector.broadcast %cst_64 : f32 to vector<8x128xf32>
    %224 = arith.addf %223, %222 : vector<8x128xf32>
    %225 = arith.divf %223, %224 : vector<8x128xf32>
    %226 = vector.extract_strided_slice %219 {offsets = [0, 128], sizes = [8, 128], strides = [1, 1]} : vector<8x512xf32> to vector<8x128xf32>
    %227 = arith.negf %226 : vector<8x128xf32>
    %228 = math.exp %227 : vector<8x128xf32>
    %cst_65 = arith.constant 1.000000e+00 : f32
    %229 = vector.broadcast %cst_65 : f32 to vector<8x128xf32>
    %230 = arith.addf %229, %228 : vector<8x128xf32>
    %231 = arith.divf %229, %230 : vector<8x128xf32>
    %232 = vector.extract_strided_slice %219 {offsets = [0, 256], sizes = [8, 128], strides = [1, 1]} : vector<8x512xf32> to vector<8x128xf32>
    %233 = arith.negf %232 : vector<8x128xf32>
    %234 = math.exp %233 : vector<8x128xf32>
    %cst_66 = arith.constant 1.000000e+00 : f32
    %235 = vector.broadcast %cst_66 : f32 to vector<8x128xf32>
    %236 = arith.addf %235, %234 : vector<8x128xf32>
    %237 = arith.divf %235, %236 : vector<8x128xf32>
    %238 = vector.extract_strided_slice %219 {offsets = [0, 384], sizes = [8, 128], strides = [1, 1]} : vector<8x512xf32> to vector<8x128xf32>
    %239 = arith.negf %238 : vector<8x128xf32>
    %240 = math.exp %239 : vector<8x128xf32>
    %cst_67 = arith.constant 1.000000e+00 : f32
    %241 = vector.broadcast %cst_67 : f32 to vector<8x128xf32>
    %242 = arith.addf %241, %240 : vector<8x128xf32>
    %243 = arith.divf %241, %242 : vector<8x128xf32>
    %244 = arith.mulf %225, %217 : vector<8x128xf32>
    %245 = arith.mulf %231, %243 : vector<8x128xf32>
    %246 = arith.addf %244, %245 : vector<8x128xf32>
    %247 = math.tanh %246 : vector<8x128xf32>
    %248 = arith.mulf %237, %247 : vector<8x128xf32>
    %249 = arith.index_cast %c4_i32 : i32 to index
    %c0_68 = arith.constant 0 : index
    %c0_69 = arith.constant 0 : index
    %250 = vector.load %arg7[%249, %c0_68, %c0_69] : memref<8x8x128xf32, #tpu.memory_space<vmem>>, vector<1x8x128xf32>
    %251 = vector.shape_cast %250 : vector<1x8x128xf32> to vector<8x128xf32>
    %252 = vector.shape_cast %248 : vector<8x128xf32> to vector<1x8x128xf32>
    tpu.vector_store %arg7[%249, %c0_68, %c0_69], %252 {strides = array<i32>} : memref<8x8x128xf32, #tpu.memory_space<vmem>>, vector<1x8x128xf32>,
    %c5_i32 = arith.constant 5 : i32
    %253 = arith.index_cast %c5_i32 : i32 to index
    %c0_70 = arith.constant 0 : index
    %c0_71 = arith.constant 0 : index
    %254 = vector.load %arg2[%253, %c0_70, %c0_71] : memref<8x8x512xf32, #tpu.memory_space<vmem>>, vector<1x8x512xf32>
    %255 = vector.shape_cast %254 : vector<1x8x512xf32> to vector<8x512xf32>
    %256 = arith.index_cast %c5_i32 : i32 to index
    %c0_72 = arith.constant 0 : index
    %c0_73 = arith.constant 0 : index
    %257 = vector.load %arg3[%256, %c0_72, %c0_73] : memref<8x8x1xf32, #tpu.memory_space<vmem>>, vector<1x8x1xf32>
    %258 = vector.shape_cast %257 : vector<1x8x1xf32> to vector<8x1xf32>
    %cst_74 = arith.constant dense<0.000000e+00> : vector<8x128xf32>
    %259 = tpu.matmul %246, %3, %cst_74 {dimension_numbers = #tpu.dot_dimension_numbers<[1], [0], [0], [1], [0, 0, 1, 1], [], []>} : vector<8x128xf32>, vector<128x128xf32>, vector<8x128xf32> -> vector<8x128xf32>
    %260 = vector.broadcast %4 : vector<1x128xf32> to vector<8x128xf32>
    %261 = arith.addf %259, %260 : vector<8x128xf32>
    %262 = math.tanh %261 : vector<8x128xf32>
    %263 = arith.subf %246, %262 : vector<8x128xf32>
    %264 = vector.broadcast %258 : vector<8x1xf32> to vector<8x128xf32>
    %265 = arith.mulf %262, %264 : vector<8x128xf32>
    %266 = arith.addf %263, %265 : vector<8x128xf32>
    %cst_75 = arith.constant dense<0.000000e+00> : vector<8x512xf32>
    %267 = tpu.matmul %248, %5, %cst_75 {dimension_numbers = #tpu.dot_dimension_numbers<[1], [0], [0], [1], [0, 0, 1, 1], [], []>} : vector<8x128xf32>, vector<128x512xf32>, vector<8x512xf32> -> vector<8x512xf32>
    %268 = arith.addf %267, %255 : vector<8x512xf32>
    %269 = vector.extract_strided_slice %268 {offsets = [0, 0], sizes = [8, 128], strides = [1, 1]} : vector<8x512xf32> to vector<8x128xf32>
    %270 = arith.negf %269 : vector<8x128xf32>
    %271 = math.exp %270 : vector<8x128xf32>
    %cst_76 = arith.constant 1.000000e+00 : f32
    %272 = vector.broadcast %cst_76 : f32 to vector<8x128xf32>
    %273 = arith.addf %272, %271 : vector<8x128xf32>
    %274 = arith.divf %272, %273 : vector<8x128xf32>
    %275 = vector.extract_strided_slice %268 {offsets = [0, 128], sizes = [8, 128], strides = [1, 1]} : vector<8x512xf32> to vector<8x128xf32>
    %276 = arith.negf %275 : vector<8x128xf32>
    %277 = math.exp %276 : vector<8x128xf32>
    %cst_77 = arith.constant 1.000000e+00 : f32
    %278 = vector.broadcast %cst_77 : f32 to vector<8x128xf32>
    %279 = arith.addf %278, %277 : vector<8x128xf32>
    %280 = arith.divf %278, %279 : vector<8x128xf32>
    %281 = vector.extract_strided_slice %268 {offsets = [0, 256], sizes = [8, 128], strides = [1, 1]} : vector<8x512xf32> to vector<8x128xf32>
    %282 = arith.negf %281 : vector<8x128xf32>
    %283 = math.exp %282 : vector<8x128xf32>
    %cst_78 = arith.constant 1.000000e+00 : f32
    %284 = vector.broadcast %cst_78 : f32 to vector<8x128xf32>
    %285 = arith.addf %284, %283 : vector<8x128xf32>
    %286 = arith.divf %284, %285 : vector<8x128xf32>
    %287 = vector.extract_strided_slice %268 {offsets = [0, 384], sizes = [8, 128], strides = [1, 1]} : vector<8x512xf32> to vector<8x128xf32>
    %288 = arith.negf %287 : vector<8x128xf32>
    %289 = math.exp %288 : vector<8x128xf32>
    %cst_79 = arith.constant 1.000000e+00 : f32
    %290 = vector.broadcast %cst_79 : f32 to vector<8x128xf32>
    %291 = arith.addf %290, %289 : vector<8x128xf32>
    %292 = arith.divf %290, %291 : vector<8x128xf32>
    %293 = arith.mulf %274, %266 : vector<8x128xf32>
    %294 = arith.mulf %280, %292 : vector<8x128xf32>
    %295 = arith.addf %293, %294 : vector<8x128xf32>
    %296 = math.tanh %295 : vector<8x128xf32>
    %297 = arith.mulf %286, %296 : vector<8x128xf32>
    %298 = arith.index_cast %c5_i32 : i32 to index
    %c0_80 = arith.constant 0 : index
    %c0_81 = arith.constant 0 : index
    %299 = vector.load %arg7[%298, %c0_80, %c0_81] : memref<8x8x128xf32, #tpu.memory_space<vmem>>, vector<1x8x128xf32>
    %300 = vector.shape_cast %299 : vector<1x8x128xf32> to vector<8x128xf32>
    %301 = vector.shape_cast %297 : vector<8x128xf32> to vector<1x8x128xf32>
    tpu.vector_store %arg7[%298, %c0_80, %c0_81], %301 {strides = array<i32>} : memref<8x8x128xf32, #tpu.memory_space<vmem>>, vector<1x8x128xf32>,
    %c6_i32 = arith.constant 6 : i32
    %302 = arith.index_cast %c6_i32 : i32 to index
    %c0_82 = arith.constant 0 : index
    %c0_83 = arith.constant 0 : index
    %303 = vector.load %arg2[%302, %c0_82, %c0_83] : memref<8x8x512xf32, #tpu.memory_space<vmem>>, vector<1x8x512xf32>
    %304 = vector.shape_cast %303 : vector<1x8x512xf32> to vector<8x512xf32>
    %305 = arith.index_cast %c6_i32 : i32 to index
    %c0_84 = arith.constant 0 : index
    %c0_85 = arith.constant 0 : index
    %306 = vector.load %arg3[%305, %c0_84, %c0_85] : memref<8x8x1xf32, #tpu.memory_space<vmem>>, vector<1x8x1xf32>
    %307 = vector.shape_cast %306 : vector<1x8x1xf32> to vector<8x1xf32>
    %cst_86 = arith.constant dense<0.000000e+00> : vector<8x128xf32>
    %308 = tpu.matmul %295, %3, %cst_86 {dimension_numbers = #tpu.dot_dimension_numbers<[1], [0], [0], [1], [0, 0, 1, 1], [], []>} : vector<8x128xf32>, vector<128x128xf32>, vector<8x128xf32> -> vector<8x128xf32>
    %309 = vector.broadcast %4 : vector<1x128xf32> to vector<8x128xf32>
    %310 = arith.addf %308, %309 : vector<8x128xf32>
    %311 = math.tanh %310 : vector<8x128xf32>
    %312 = arith.subf %295, %311 : vector<8x128xf32>
    %313 = vector.broadcast %307 : vector<8x1xf32> to vector<8x128xf32>
    %314 = arith.mulf %311, %313 : vector<8x128xf32>
    %315 = arith.addf %312, %314 : vector<8x128xf32>
    %cst_87 = arith.constant dense<0.000000e+00> : vector<8x512xf32>
    %316 = tpu.matmul %297, %5, %cst_87 {dimension_numbers = #tpu.dot_dimension_numbers<[1], [0], [0], [1], [0, 0, 1, 1], [], []>} : vector<8x128xf32>, vector<128x512xf32>, vector<8x512xf32> -> vector<8x512xf32>
    %317 = arith.addf %316, %304 : vector<8x512xf32>
    %318 = vector.extract_strided_slice %317 {offsets = [0, 0], sizes = [8, 128], strides = [1, 1]} : vector<8x512xf32> to vector<8x128xf32>
    %319 = arith.negf %318 : vector<8x128xf32>
    %320 = math.exp %319 : vector<8x128xf32>
    %cst_88 = arith.constant 1.000000e+00 : f32
    %321 = vector.broadcast %cst_88 : f32 to vector<8x128xf32>
    %322 = arith.addf %321, %320 : vector<8x128xf32>
    %323 = arith.divf %321, %322 : vector<8x128xf32>
    %324 = vector.extract_strided_slice %317 {offsets = [0, 128], sizes = [8, 128], strides = [1, 1]} : vector<8x512xf32> to vector<8x128xf32>
    %325 = arith.negf %324 : vector<8x128xf32>
    %326 = math.exp %325 : vector<8x128xf32>
    %cst_89 = arith.constant 1.000000e+00 : f32
    %327 = vector.broadcast %cst_89 : f32 to vector<8x128xf32>
    %328 = arith.addf %327, %326 : vector<8x128xf32>
    %329 = arith.divf %327, %328 : vector<8x128xf32>
    %330 = vector.extract_strided_slice %317 {offsets = [0, 256], sizes = [8, 128], strides = [1, 1]} : vector<8x512xf32> to vector<8x128xf32>
    %331 = arith.negf %330 : vector<8x128xf32>
    %332 = math.exp %331 : vector<8x128xf32>
    %cst_90 = arith.constant 1.000000e+00 : f32
    %333 = vector.broadcast %cst_90 : f32 to vector<8x128xf32>
    %334 = arith.addf %333, %332 : vector<8x128xf32>
    %335 = arith.divf %333, %334 : vector<8x128xf32>
    %336 = vector.extract_strided_slice %317 {offsets = [0, 384], sizes = [8, 128], strides = [1, 1]} : vector<8x512xf32> to vector<8x128xf32>
    %337 = arith.negf %336 : vector<8x128xf32>
    %338 = math.exp %337 : vector<8x128xf32>
    %cst_91 = arith.constant 1.000000e+00 : f32
    %339 = vector.broadcast %cst_91 : f32 to vector<8x128xf32>
    %340 = arith.addf %339, %338 : vector<8x128xf32>
    %341 = arith.divf %339, %340 : vector<8x128xf32>
    %342 = arith.mulf %323, %315 : vector<8x128xf32>
    %343 = arith.mulf %329, %341 : vector<8x128xf32>
    %344 = arith.addf %342, %343 : vector<8x128xf32>
    %345 = math.tanh %344 : vector<8x128xf32>
    %346 = arith.mulf %335, %345 : vector<8x128xf32>
    %347 = arith.index_cast %c6_i32 : i32 to index
    %c0_92 = arith.constant 0 : index
    %c0_93 = arith.constant 0 : index
    %348 = vector.load %arg7[%347, %c0_92, %c0_93] : memref<8x8x128xf32, #tpu.memory_space<vmem>>, vector<1x8x128xf32>
    %349 = vector.shape_cast %348 : vector<1x8x128xf32> to vector<8x128xf32>
    %350 = vector.shape_cast %346 : vector<8x128xf32> to vector<1x8x128xf32>
    tpu.vector_store %arg7[%347, %c0_92, %c0_93], %350 {strides = array<i32>} : memref<8x8x128xf32, #tpu.memory_space<vmem>>, vector<1x8x128xf32>,
    %c7_i32 = arith.constant 7 : i32
    %351 = arith.index_cast %c7_i32 : i32 to index
    %c0_94 = arith.constant 0 : index
    %c0_95 = arith.constant 0 : index
    %352 = vector.load %arg2[%351, %c0_94, %c0_95] : memref<8x8x512xf32, #tpu.memory_space<vmem>>, vector<1x8x512xf32>
    %353 = vector.shape_cast %352 : vector<1x8x512xf32> to vector<8x512xf32>
    %354 = arith.index_cast %c7_i32 : i32 to index
    %c0_96 = arith.constant 0 : index
    %c0_97 = arith.constant 0 : index
    %355 = vector.load %arg3[%354, %c0_96, %c0_97] : memref<8x8x1xf32, #tpu.memory_space<vmem>>, vector<1x8x1xf32>
    %356 = vector.shape_cast %355 : vector<1x8x1xf32> to vector<8x1xf32>
    %cst_98 = arith.constant dense<0.000000e+00> : vector<8x128xf32>
    %357 = tpu.matmul %344, %3, %cst_98 {dimension_numbers = #tpu.dot_dimension_numbers<[1], [0], [0], [1], [0, 0, 1, 1], [], []>} : vector<8x128xf32>, vector<128x128xf32>, vector<8x128xf32> -> vector<8x128xf32>
    %358 = vector.broadcast %4 : vector<1x128xf32> to vector<8x128xf32>
    %359 = arith.addf %357, %358 : vector<8x128xf32>
    %360 = math.tanh %359 : vector<8x128xf32>
    %361 = arith.subf %344, %360 : vector<8x128xf32>
    %362 = vector.broadcast %356 : vector<8x1xf32> to vector<8x128xf32>
    %363 = arith.mulf %360, %362 : vector<8x128xf32>
    %364 = arith.addf %361, %363 : vector<8x128xf32>
    %cst_99 = arith.constant dense<0.000000e+00> : vector<8x512xf32>
    %365 = tpu.matmul %346, %5, %cst_99 {dimension_numbers = #tpu.dot_dimension_numbers<[1], [0], [0], [1], [0, 0, 1, 1], [], []>} : vector<8x128xf32>, vector<128x512xf32>, vector<8x512xf32> -> vector<8x512xf32>
    %366 = arith.addf %365, %353 : vector<8x512xf32>
    %367 = vector.extract_strided_slice %366 {offsets = [0, 0], sizes = [8, 128], strides = [1, 1]} : vector<8x512xf32> to vector<8x128xf32>
    %368 = arith.negf %367 : vector<8x128xf32>
    %369 = math.exp %368 : vector<8x128xf32>
    %cst_100 = arith.constant 1.000000e+00 : f32
    %370 = vector.broadcast %cst_100 : f32 to vector<8x128xf32>
    %371 = arith.addf %370, %369 : vector<8x128xf32>
    %372 = arith.divf %370, %371 : vector<8x128xf32>
    %373 = vector.extract_strided_slice %366 {offsets = [0, 128], sizes = [8, 128], strides = [1, 1]} : vector<8x512xf32> to vector<8x128xf32>
    %374 = arith.negf %373 : vector<8x128xf32>
    %375 = math.exp %374 : vector<8x128xf32>
    %cst_101 = arith.constant 1.000000e+00 : f32
    %376 = vector.broadcast %cst_101 : f32 to vector<8x128xf32>
    %377 = arith.addf %376, %375 : vector<8x128xf32>
    %378 = arith.divf %376, %377 : vector<8x128xf32>
    %379 = vector.extract_strided_slice %366 {offsets = [0, 256], sizes = [8, 128], strides = [1, 1]} : vector<8x512xf32> to vector<8x128xf32>
    %380 = arith.negf %379 : vector<8x128xf32>
    %381 = math.exp %380 : vector<8x128xf32>
    %cst_102 = arith.constant 1.000000e+00 : f32
    %382 = vector.broadcast %cst_102 : f32 to vector<8x128xf32>
    %383 = arith.addf %382, %381 : vector<8x128xf32>
    %384 = arith.divf %382, %383 : vector<8x128xf32>
    %385 = vector.extract_strided_slice %366 {offsets = [0, 384], sizes = [8, 128], strides = [1, 1]} : vector<8x512xf32> to vector<8x128xf32>
    %386 = arith.negf %385 : vector<8x128xf32>
    %387 = math.exp %386 : vector<8x128xf32>
    %cst_103 = arith.constant 1.000000e+00 : f32
    %388 = vector.broadcast %cst_103 : f32 to vector<8x128xf32>
    %389 = arith.addf %388, %387 : vector<8x128xf32>
    %390 = arith.divf %388, %389 : vector<8x128xf32>
    %391 = arith.mulf %372, %364 : vector<8x128xf32>
    %392 = arith.mulf %378, %390 : vector<8x128xf32>
    %393 = arith.addf %391, %392 : vector<8x128xf32>
    %394 = math.tanh %393 : vector<8x128xf32>
    %395 = arith.mulf %384, %394 : vector<8x128xf32>
    %396 = arith.index_cast %c7_i32 : i32 to index
    %c0_104 = arith.constant 0 : index
    %c0_105 = arith.constant 0 : index
    %397 = vector.load %arg7[%396, %c0_104, %c0_105] : memref<8x8x128xf32, #tpu.memory_space<vmem>>, vector<1x8x128xf32>
    %398 = vector.shape_cast %397 : vector<1x8x128xf32> to vector<8x128xf32>
    %399 = vector.shape_cast %395 : vector<8x128xf32> to vector<1x8x128xf32>
    tpu.vector_store %arg7[%396, %c0_104, %c0_105], %399 {strides = array<i32>} : memref<8x8x128xf32, #tpu.memory_space<vmem>>, vector<1x8x128xf32>,
    %c8_i32 = arith.constant 8 : i32
    %c0_106 = arith.constant 0 : index
    %c0_107 = arith.constant 0 : index
    %400 = vector.load %arg8[%c0_106, %c0_107] : memref<8x128xf32, #tpu.memory_space<vmem>>, vector<8x128xf32>
    tpu.vector_store %arg8[%c0_106, %c0_107], %395 {strides = array<i32>} : memref<8x128xf32, #tpu.memory_space<vmem>>, vector<8x128xf32>,
    %c0_108 = arith.constant 0 : index
    %c0_109 = arith.constant 0 : index
    %401 = vector.load %arg9[%c0_108, %c0_109] : memref<8x128xf32, #tpu.memory_space<vmem>>, vector<8x128xf32>
    tpu.vector_store %arg9[%c0_108, %c0_109], %393 {strides = array<i32>} : memref<8x128xf32, #tpu.memory_space<vmem>>, vector<8x128xf32>,
    return
  }
  func.func @transform_0(%arg0: i32, %arg1: i32) -> (i32, i32, i32) {
    %c0_i32 = arith.constant 0 : i32
    %c0_i32_0 = arith.constant 0 : i32
    return %arg1, %arg0, %c0_i32 : i32, i32, i32
  }
  func.func @transform_1(%arg0: i32, %arg1: i32) -> (i32, i32, i32) {
    %c0_i32 = arith.constant 0 : i32
    %c0_i32_0 = arith.constant 0 : i32
    return %arg1, %arg0, %c0_i32 : i32, i32, i32
  }
  func.func @transform_2(%arg0: i32, %arg1: i32) -> (i32, i32) {
    %c0_i32 = arith.constant 0 : i32
    %c0_i32_0 = arith.constant 0 : i32
    %c0_i32_1 = arith.constant 0 : i32
    return %c0_i32, %c0_i32_0 : i32, i32
  }
  func.func @transform_3(%arg0: i32, %arg1: i32) -> (i32, i32) {
    %c0_i32 = arith.constant 0 : i32
    %c0_i32_0 = arith.constant 0 : i32
    %c0_i32_1 = arith.constant 0 : i32
    return %c0_i32, %c0_i32_0 : i32, i32
  }
  func.func @transform_4(%arg0: i32, %arg1: i32) -> (i32, i32) {
    %c0_i32 = arith.constant 0 : i32
    %c0_i32_0 = arith.constant 0 : i32
    %c0_i32_1 = arith.constant 0 : i32
    return %c0_i32, %c0_i32_0 : i32, i32
  }
  func.func @transform_5(%arg0: i32, %arg1: i32) -> (i32, i32, i32) {
    %c0_i32 = arith.constant 0 : i32
    %c0_i32_0 = arith.constant 0 : i32
    return %arg1, %arg0, %c0_i32 : i32, i32, i32
  }
}

</mosaic_0001>

<bundles_post_ra>
// kernel: tpu_custom_call.1
= control target key start
LH: loop header
LB: loop body
LE: loop exit
PB: predicated region body
PF: predicated region fallthrough
CT: control target
= control target key end

     0   :  { %10 = vsyncpa [#allocation5], 0  ;;  %s4342_s0 = inlined_call_operand.hbm [shape: f32[8,8,512], index: 0, kind: input, shape index: {}]   ;;  %s4343_s1 = inlined_call_operand.vmem [shape: f32[8,8,1], index: 1, kind: input, shape index: {}]   ;;  %s4344_s2 = inlined_call_operand.hbm [shape: f32[128,128], index: 2, kind: input, shape index: {}]   ;;  %s4345_s3 = inlined_call_operand.vmem [shape: f32[1,128], index: 3, kind: input, shape index: {}]   ;;  %s4346_s4 = inlined_call_operand.hbm [shape: f32[128,512], index: 4, kind: input, shape index: {}]   ;;  %s4347_s5 = inlined_call_operand.hbm [shape: f32[8,8,128], index: 5, kind: output, shape index: {}]  }
   0x1   :  { %11 = vsyncpa [#allocation8], 0 }
   0x2   :  { %12 = vsyncpa [#allocation6], 0  ;;  %s3675_s18 = smov [#allocation7]   ;;  %s3581_s22 = scalar_lea.hbm %s4344_s2, 2048 }
   0x3   :  { %s32_s19 = sshll.u32 %s3675_s18, 4  ;;  %p3582_p0 = scmp.ne.s32.totalorder %s4344_s2, %s3581_s22  ;;  %s33_s19 = int_to_ptr.vmem [resolvable:$true] %s32_s19 }
   0x4   :  { %p3585_p1 = scmp.lt.u32.totalorder %s3581_s22, %s4344_s2 }
   0x6   :  { %p3587_p2 = pnand %p3585_p1, %p3582_p0 }
   0x8   :  { %3590 = shalt.err (!%p3587_p2)
}
   0x9   :  { %s3591_s27 = scalar_lea.vmem %s33_s19, 2048  ;;  %p3596_p4 = scmp.lt.s32.totalorder %s33_s19, %s33_s19 }
   0xa   :  { %p3592_p3 = scmp.ne.s32.totalorder %s33_s19, %s3591_s27  ;;  %p3597_p5 = scmp.lt.s32.totalorder %s3591_s27, %s3591_s27 }
   0xc   :  { %p3598_p6 = por %p3597_p5, %p3596_p4 }
   0xe   :  { %p3599_p7 = pnand %p3598_p6, %p3592_p3 }
  0x10   :  { %3602 = shalt.err (!%p3599_p7)
}
  0x11   :  { %s3676_s28 = smov 128   ;;  %s3677_s29 = smov 8  }
  0x12   :  { %38 = dma.hbm_to_vmem [thread:$0]  %s4344_s2, 2048, %s33_s19, [#allocation8], %s3676_s28, %s3676_s28, %s3677_s29  }
  0x13   :  { %s3678_s7 = smov [#allocation4]   ;;  %s3603_s11 = scalar_lea.hbm %s4342_s0, 4096 }
  0x14   :  { %s18_s8 = sshll.u32 %s3678_s7, 4  ;;  %p3604_p8 = scmp.ne.s32.totalorder %s4342_s0, %s3603_s11  ;;  %s19_s8 = int_to_ptr.vmem [resolvable:$true] %s18_s8 }
  0x15   :  { %p3607_p9 = scmp.lt.u32.totalorder %s3603_s11, %s4342_s0 }
  0x17   :  { %p3609_p10 = pnand %p3607_p9, %p3604_p8 }
  0x19   :  { %3612 = shalt.err (!%p3609_p10)
}
  0x1a   :  { %s3613_s16 = scalar_lea.vmem %s19_s8, 4096  ;;  %p3618_p12 = scmp.lt.s32.totalorder %s19_s8, %s19_s8 }
  0x1b   :  { %p3614_p11 = scmp.ne.s32.totalorder %s19_s8, %s3613_s16  ;;  %p3619_p13 = scmp.lt.s32.totalorder %s3613_s16, %s3613_s16 }
  0x1d   :  { %p3620_p0 = por %p3619_p13, %p3618_p12 }
  0x1f   :  { %p3621_p1 = pnand %p3620_p0, %p3614_p11 }
  0x21   :  { %3624 = shalt.err (!%p3621_p1)
}
  0x22   :  { %s3679_s2 = smov 512   ;;  %s3680_s17 = smov 32  }
  0x23   :  { %24 = dma.hbm_to_vmem [thread:$0]  %s4342_s0, 4096, %s19_s8, [#allocation5], %s3679_s2, %s3679_s2, %s3680_s17  }
  0x24   :  { %s3681_s20 = smov [#allocation9]   ;;  %s3625_s24 = scalar_lea.hbm %s4346_s4, 8192 }
  0x25   :  { %s46_s21 = sshll.u32 %s3681_s20, 4  ;;  %p3626_p2 = scmp.ne.s32.totalorder %s4346_s4, %s3625_s24  ;;  %s47_s21 = int_to_ptr.vmem [resolvable:$true] %s46_s21 }
  0x26   :  { %p3629_p3 = scmp.lt.u32.totalorder %s3625_s24, %s4346_s4 }
  0x28   :  { %p3631_p4 = pnand %p3629_p3, %p3626_p2 }
  0x2a   :  { %3634 = shalt.err (!%p3631_p4)
}
  0x2b   :  { %s3635_s6 = scalar_lea.vmem %s47_s21, 8192  ;;  %p3640_p6 = scmp.lt.s32.totalorder %s47_s21, %s47_s21 }
  0x2c   :  { %p3636_p5 = scmp.ne.s32.totalorder %s47_s21, %s3635_s6  ;;  %p3641_p7 = scmp.lt.s32.totalorder %s3635_s6, %s3635_s6 }
  0x2e   :  { %p3642_p8 = por %p3641_p7, %p3640_p6 }
  0x30   :  { %p3643_p9 = pnand %p3642_p8, %p3636_p5 }
  0x32   :  { %3646 = shalt.err (!%p3643_p9)
}
  0x33   :  { %52 = dma.hbm_to_vmem [thread:$0]  %s4346_s4, 8192, %s47_s21, [#allocation8], %s3679_s2, %s3679_s2, %s3680_s17  }
  0x34   :  { %3669 = dma.done.wait [#allocation5], 4096  }
  0x35   :  { %3670 = vsyncadd [#allocation5], 4294963200 }
  0x36   :  { %3671 = dma.done.wait [#allocation8], 10240  }
  0x37   :  { %3672 = vsyncadd [#allocation8], 4294957056  ;;  %v4348_v0 = vmov 0.0|0.0   ;;  %vm3683_vm0 = vmmov 0   ;;  %v3684_v1 = vmov 0.0   ;;  %v3685_v2 = vmov 0  }
  0x38   :  { %2702 = vmatprep.subr.bf16.mxu0 %v4348_v0  ;;  %2454 = vmatprep.mubr.msk.f32.mxu0 %vm3683_vm0, %v3684_v1  ;;  %v68_v3 = vld [vmem:[#allocation7] sm:$0xff]  ;;  %v69_v4 = vld [vmem:[#allocation7 + $0x8] sm:$0xff]  ;;  %v70_v12 = vld [vmem:[#allocation7 + $0x10] sm:$0xff] }
  0x39   :  { %305 = vmatprep.mubr.f32.mxu1 %v3684_v1  ;;  %3418 = vset.pattern.permute.xlu0 %v3685_v2  ;;  %v86_v5 = vld [vmem:[#allocation9 + $0x8] sm:$0xff]  ;;  %v3760_v6 = vpack.c.bf16 %v69_v4, %v68_v3  ;;  %v85_v8 = vld [vmem:[#allocation9] sm:$0xff]  ;;  %v71_v13 = vld [vmem:[#allocation7 + $0x18] sm:$0xff] }
  0x3a   :  { %3419 = vset.pattern.permute.xlu1 %v3685_v2  ;;  %v90_v7 = vld [vmem:[#allocation9 + $0x28] sm:$0xff]  ;;  %v89_v9 = vld [vmem:[#allocation9 + $0x20] sm:$0xff]  ;;  %v3767_v15 = vpack.c.bf16 %v71_v13, %v70_v12  ;;  %v74_v31 = vld [vmem:[#allocation7 + $0x30] sm:$0xff] }
  0x3b   :  { %v3762_v10 = vpack.c.bf16 %v90_v7, %v86_v5  ;;  %v3764_v11 = vpack.c.bf16 %v89_v9, %v85_v8  ;;  %v94_v14 = vld [vmem:[#allocation9 + $0x48] sm:$0xff]  ;;  %2704 = vmatpush3.bf16.msra.mxu0 %v3760_v6  ;;  %v93_v17 = vld [vmem:[#allocation9 + $0x40] sm:$0xff]  ;;  %v75_v32 = vld [vmem:[#allocation7 + $0x38] sm:$0xff] }
  0x3c   :  { %v98_v16 = vld [vmem:[#allocation9 + $0x68] sm:$0xff]  ;;  %v97_v18 = vld [vmem:[#allocation9 + $0x60] sm:$0xff]  ;;  %2705 = vmatprep.subr.bf16.mxu0 %v4348_v0  ;;  %v3790_v37 = vpack.c.bf16 %v75_v32, %v74_v31  ;;  %v78_v49 = vld [vmem:[#allocation7 + $0x50] sm:$0xff] }
  0x3d   :  { %2727 = vmatprep.subr.bf16.mxu1 %v3762_v10  ;;  %v3771_v19 = vpack.c.bf16 %v98_v16, %v94_v14  ;;  %v72_v20 = vld [vmem:[#allocation7 + $0x20] sm:$0xff]  ;;  %v73_v21 = vld [vmem:[#allocation7 + $0x28] sm:$0xff]  ;;  %v3774_v23 = vpack.c.bf16 %v97_v18, %v93_v17  ;;  %v79_v50 = vld [vmem:[#allocation7 + $0x58] sm:$0xff] }
  0x3e   :  { %v102_v22 = vld [vmem:[#allocation9 + $0x88] sm:$0xff]  ;;  %2729 = vmatpush1.bf16.msra.mxu1 %v3764_v11  ;;  %v101_v26 = vld [vmem:[#allocation9 + $0x80] sm:$0xff]  ;;  %v3780_v28 = vpack.c.bf16 %v73_v21, %v72_v20  ;;  %v3810_v55 = vpack.c.bf16 %v79_v50, %v78_v49  ;;  %v82_v5 = vld [vmem:[#allocation7 + $0x70] sm:$0xff] }
  0x3f   :  { %v106_v24 = vld [vmem:[#allocation9 + $0xa8] sm:$0xff]  ;;  %2731 = vmatprep.subr.bf16.mxu1 %v3771_v19  ;;  %v105_v27 = vld [vmem:[#allocation9 + $0xa0] sm:$0xff]  ;;  %2707 = vmatpush3.bf16.msra.mxu0 %v3767_v15  ;;  %v83_v7 = vld [vmem:[#allocation7 + $0x78] sm:$0xff] }
  0x40   :  { %v3777_v25 = vpack.c.bf16 %v106_v24, %v102_v22  ;;  %v110_v29 = vld [vmem:[#allocation9 + $0xc8] sm:$0xff]  ;;  %2708 = vmatprep.subr.bf16.mxu0 %v4348_v0  ;;  %v3784_v33 = vpack.c.bf16 %v105_v27, %v101_v26  ;;  %v109_v35 = vld [vmem:[#allocation9 + $0xc0] sm:$0xff]  ;;  %v88_v9 = vld [vmem:[#allocation9 + $0x18] sm:$0xff]  ;;  %v3833_v18 = vpack.c.bf16 %v83_v7, %v82_v5 }
  0x41   :  { %v114_v30 = vld [vmem:[#allocation9 + $0xe8] sm:$0xff]  ;;  %v113_v36 = vld [vmem:[#allocation9 + $0xe0] sm:$0xff]  ;;  %v92_v12 = vld [vmem:[#allocation9 + $0x38] sm:$0xff] }
  0x42   :  { %2733 = vmatpush1.bf16.msra.mxu1 %v3774_v23  ;;  %v3787_v34 = vpack.c.bf16 %v114_v30, %v110_v29  ;;  %v118_v38 = vld [vmem:[#allocation9 + $0x108] sm:$0xff]  ;;  %v76_v40 = vld [vmem:[#allocation7 + $0x40] sm:$0xff]  ;;  %v3794_v42 = vpack.c.bf16 %v113_v36, %v109_v35  ;;  %v3836_v20 = vpack.c.bf16 %v92_v12, %v88_v9  ;;  %v87_v21 = vld [vmem:[#allocation9 + $0x10] sm:$0xff] }
  0x43   :  { %2735 = vmatprep.subr.bf16.mxu1 %v3777_v25  ;;  %2710 = vmatpush3.bf16.msra.mxu0 %v3780_v28  ;;  %v122_v39 = vld [vmem:[#allocation9 + $0x128] sm:$0xff]  ;;  %v117_v44 = vld [vmem:[#allocation9 + $0x100] sm:$0xff]  ;;  %v91_v22 = vld [vmem:[#allocation9 + $0x30] sm:$0xff] }
  0x44   :  { %2711 = vmatprep.subr.bf16.mxu0 %v4348_v0  ;;  %v77_v41 = vld [vmem:[#allocation7 + $0x48] sm:$0xff]  ;;  %v3797_v43 = vpack.c.bf16 %v122_v39, %v118_v38  ;;  %v121_v45 = vld [vmem:[#allocation9 + $0x120] sm:$0xff]  ;;  %v96_v27 = vld [vmem:[#allocation9 + $0x58] sm:$0xff]  ;;  %v3846_v30 = vpack.c.bf16 %v91_v22, %v87_v21 }
  0x45   :  { %v3800_v46 = vpack.c.bf16 %v77_v41, %v76_v40  ;;  %v126_v47 = vld [vmem:[#allocation9 + $0x148] sm:$0xff]  ;;  %v3804_v51 = vpack.c.bf16 %v121_v45, %v117_v44  ;;  %v125_v53 = vld [vmem:[#allocation9 + $0x140] sm:$0xff]  ;;  %v100_v29 = vld [vmem:[#allocation9 + $0x78] sm:$0xff] }
  0x46   :  { %2737 = vmatpush1.bf16.msra.mxu1 %v3784_v33  ;;  %v130_v48 = vld [vmem:[#allocation9 + $0x168] sm:$0xff]  ;;  %v129_v54 = vld [vmem:[#allocation9 + $0x160] sm:$0xff]  ;;  %v3849_v31 = vpack.c.bf16 %v100_v29, %v96_v27  ;;  %v95_v32 = vld [vmem:[#allocation9 + $0x50] sm:$0xff] }
  0x47   :  { %2739 = vmatprep.subr.bf16.mxu1 %v3787_v34  ;;  %2713 = vmatpush3.bf16.msra.mxu0 %v3790_v37  ;;  %v3807_v52 = vpack.c.bf16 %v130_v48, %v126_v47  ;;  %v134_v56 = vld [vmem:[#allocation9 + $0x188] sm:$0xff]  ;;  %v80_v58 = vld [vmem:[#allocation7 + $0x60] sm:$0xff]  ;;  %v3814_v60 = vpack.c.bf16 %v129_v54, %v125_v53  ;;  %v99_v35 = vld [vmem:[#allocation9 + $0x70] sm:$0xff] }
  0x48   :  { %2714 = vmatprep.subr.bf16.mxu0 %v4348_v0  ;;  %v138_v57 = vld [vmem:[#allocation9 + $0x1a8] sm:$0xff]  ;;  %v133_v62 = vld [vmem:[#allocation9 + $0x180] sm:$0xff]  ;;  %v104_v36 = vld [vmem:[#allocation9 + $0x98] sm:$0xff]  ;;  %v3858_v40 = vpack.c.bf16 %v99_v35, %v95_v32 }
  0x49   :  { %v81_v59 = vld [vmem:[#allocation7 + $0x68] sm:$0xff]  ;;  %v3817_v61 = vpack.c.bf16 %v138_v57, %v134_v56  ;;  %v137_v63 = vld [vmem:[#allocation9 + $0x1a0] sm:$0xff]  ;;  %v108_v38 = vld [vmem:[#allocation9 + $0xb8] sm:$0xff] }
  0x4a   :  { %2741 = vmatpush1.bf16.msra.mxu1 %v3794_v42  ;;  %v3820_v2 = vpack.c.bf16 %v81_v59, %v80_v58  ;;  %v142_v3 = vld [vmem:[#allocation9 + $0x1c8] sm:$0xff]  ;;  %v3824_v8 = vpack.c.bf16 %v137_v63, %v133_v62  ;;  %v141_v14 = vld [vmem:[#allocation9 + $0x1c0] sm:$0xff]  ;;  %v3863_v41 = vpack.c.bf16 %v108_v38, %v104_v36  ;;  %v103_v44 = vld [vmem:[#allocation9 + $0x90] sm:$0xff] }
  0x4b   :  { %2743 = vmatprep.subr.bf16.mxu1 %v3797_v43  ;;  %2716 = vmatpush3.bf16.msra.mxu0 %v3800_v46  ;;  %v146_v4 = vld [vmem:[#allocation9 + $0x1e8] sm:$0xff]  ;;  %v145_v16 = vld [vmem:[#allocation9 + $0x1e0] sm:$0xff]  ;;  %v107_v45 = vld [vmem:[#allocation9 + $0xb0] sm:$0xff] }
  0x4c   :  { %2717 = vmatprep.subr.bf16.mxu0 %v4348_v0  ;;  %v3827_v13 = vpack.c.bf16 %v146_v4, %v142_v3  ;;  %v155_v17 = vld [vmem:[%s4343_s1] sm:$0xff]  ;;  %v2251_v24 = vld [vmem:[%s4343_s1 + $0x8] sm:$0xff]  ;;  %v3842_v26 = vpack.c.bf16 %v145_v16, %v141_v14  ;;  %v112_v47 = vld [vmem:[#allocation9 + $0xd8] sm:$0xff]  ;;  %v3873_v50 = vpack.c.bf16 %v107_v45, %v103_v44 }
  0x4d   :  { %236 = vperm.xlu0 %3418, %v155_v17   ;;  %v2266_v39 = vld [vmem:[%s4343_s1 + $0x20] sm:$0xff]  ;;  %v116_v48 = vld [vmem:[#allocation9 + $0xf8] sm:$0xff]  ;;  %v2276_v49 = vld [vmem:[%s4343_s1 + $0x30] sm:$0xff] }
  0x4e   :  { %2745 = vmatpush1.bf16.msra.mxu1 %v3804_v51  ;;  %v3876_v53 = vpack.c.bf16 %v116_v48, %v112_v47  ;;  %v111_v54 = vld [vmem:[#allocation9 + $0xd0] sm:$0xff]  ;;  %v120_v57 = vld [vmem:[#allocation9 + $0x118] sm:$0xff]  ;;  %v151_v47 = vld [vmem:[#allocation4] sm:$0xff] }
  0x4f   :  { %2747 = vmatprep.subr.bf16.mxu1 %v3807_v52  ;;  %2719 = vmatpush3.bf16.msra.mxu0 %v3810_v55  ;;  %v115_v56 = vld [vmem:[#allocation9 + $0xf0] sm:$0xff]  ;;  %v124_v58 = vld [vmem:[#allocation9 + $0x138] sm:$0xff] }
  0x50   :  { %2720 = vmatprep.subr.bf16.mxu0 %v4348_v0  ;;  %v3881_v59 = vpack.c.bf16 %v115_v56, %v111_v54  ;;  %v3884_v62 = vpack.c.bf16 %v124_v58, %v120_v57  ;;  %v119_v63 = vld [vmem:[#allocation9 + $0x110] sm:$0xff]  ;;  %v128_v4 = vld [vmem:[#allocation9 + $0x158] sm:$0xff]  ;;  %v3943_v57 = vld [vmem:[%s4345_s3] ss:$0 sm:$0xff] }
  0x51   :  { %494 = vperm.xlu0 %3418, %v2251_v24   ;;  %v123_v3 = vld [vmem:[#allocation9 + $0x130] sm:$0xff]  ;;  %v132_v5 = vld [vmem:[#allocation9 + $0x178] sm:$0xff] }
  0x52   :  { %2749 = vmatpush1.bf16.msra.mxu1 %v3814_v60  ;;  %v3889_v7 = vpack.c.bf16 %v123_v3, %v119_v63  ;;  %v3892_v9 = vpack.c.bf16 %v132_v5, %v128_v4  ;;  %v127_v12 = vld [vmem:[#allocation9 + $0x150] sm:$0xff]  ;;  %v136_v16 = vld [vmem:[#allocation9 + $0x198] sm:$0xff]  ;;  %v152_v5 = vld [vmem:[#allocation4 + $0x8] sm:$0xff] }
  0x53   :  { %2751 = vmatprep.subr.bf16.mxu1 %v3817_v61  ;;  %2722 = vmatpush3.bf16.msra.mxu0 %v3820_v2  ;;  %v131_v14 = vld [vmem:[#allocation9 + $0x170] sm:$0xff]  ;;  %v140_v17 = vld [vmem:[#allocation9 + $0x1b8] sm:$0xff] }
  0x54   :  { %2723 = vmatprep.subr.bf16.mxu0 %v4348_v0  ;;  %v3897_v21 = vpack.c.bf16 %v131_v14, %v127_v12  ;;  %v3900_v22 = vpack.c.bf16 %v140_v17, %v136_v16  ;;  %v135_v24 = vld [vmem:[#allocation9 + $0x190] sm:$0xff]  ;;  %v144_v29 = vld [vmem:[#allocation9 + $0x1d8] sm:$0xff] }
  0x55   :  { %1271 = vperm.xlu0 %3418, %v2266_v39   ;;  %v139_v27 = vld [vmem:[#allocation9 + $0x1b0] sm:$0xff]  ;;  %v148_v32 = vld [vmem:[#allocation9 + $0x1f8] sm:$0xff] }
  0x56   :  { %2753 = vmatpush1.bf16.msra.mxu1 %v3824_v8  ;;  %v3905_v35 = vpack.c.bf16 %v139_v27, %v135_v24  ;;  %v3908_v36 = vpack.c.bf16 %v148_v32, %v144_v29  ;;  %v143_v38 = vld [vmem:[#allocation9 + $0x1d0] sm:$0xff] }
  0x57   :  { %2755 = vmatprep.subr.bf16.mxu1 %v3827_v13  ;;  %2725 = vmatpush3.bf16.msra.mxu0 %v3833_v18  ;;  %v147_v39 = vld [vmem:[#allocation9 + $0x1f0] sm:$0xff] }
  0x58   :  { %2759 = vmatprep.subr.bf16.mxu0 %v3836_v20  ;;  %v3913_v44 = vpack.c.bf16 %v147_v39, %v143_v38  ;;  %v154_v39 = vld [vmem:[#allocation4 + $0x18] sm:$0xff] }
  0x59   :  { %1789 = vperm.xlu0 %3418, %v2276_v49  }
  0x5a   :  { %2757 = vmatpush1.bf16.msra.mxu1 %v3842_v26  ;;  %2455 = vmatmul.mubr.f32.vlgmr.msra.gmra.mrb[0].mxu0 %v3684_v1 }
  0x5b   :  { %2790 = vmatprep.subr.bf16.mxu1 %v4348_v0  ;;  %2761 = vmatpush1.bf16.msra.mxu0 %v3846_v30 }
  0x5c   :  { %376 = vmatprep.mubr.f32.mxu0 %v3684_v1  ;;  %2763 = vmatprep.subr.bf16.mxu0 %v3849_v31 }
  0x5d   :  { %306 = vmatmul.mubr.f32.vlgmr.msra.gmra.mrb[0].mxu1 %v3684_v1 }
  0x5e   :  { %2792 = vmatpush3.bf16.msra.mxu1 %v3760_v6  ;;  %2489 = vmatprep.mubr.msk.f32.mxu1 %vm3683_vm0, %v3684_v1 }
  0x5f   :  { %2793 = vmatprep.subr.bf16.mxu1 %v4348_v0  ;;  %2765 = vmatpush1.bf16.msra.mxu0 %v3858_v40 }
  0x60   :  { %2767 = vmatprep.subr.bf16.mxu0 %v3863_v41 }
  0x62   :  { %2795 = vmatpush3.bf16.msra.mxu1 %v3767_v15 }
  0x63   :  { %2796 = vmatprep.subr.bf16.mxu1 %v4348_v0  ;;  %2769 = vmatpush1.bf16.msra.mxu0 %v3873_v50 }
  0x64   :  { %2771 = vmatprep.subr.bf16.mxu0 %v3876_v53 }
  0x66   :  { %2798 = vmatpush3.bf16.msra.mxu1 %v3780_v28 }
  0x67   :  { %2799 = vmatprep.subr.bf16.mxu1 %v4348_v0  ;;  %2773 = vmatpush1.bf16.msra.mxu0 %v3881_v59 }
  0x68   :  { %2775 = vmatprep.subr.bf16.mxu0 %v3884_v62 }
  0x6a   :  { %2801 = vmatpush3.bf16.msra.mxu1 %v3790_v37 }
  0x6b   :  { %2802 = vmatprep.subr.bf16.mxu1 %v4348_v0  ;;  %2777 = vmatpush1.bf16.msra.mxu0 %v3889_v7 }
  0x6c   :  { %2779 = vmatprep.subr.bf16.mxu0 %v3892_v9 }
  0x6e   :  { %2804 = vmatpush3.bf16.msra.mxu1 %v3800_v46 }
  0x6f   :  { %2805 = vmatprep.subr.bf16.mxu1 %v4348_v0  ;;  %2781 = vmatpush1.bf16.msra.mxu0 %v3897_v21 }
  0x70   :  { %2783 = vmatprep.subr.bf16.mxu0 %v3900_v22 }
  0x72   :  { %2807 = vmatpush3.bf16.msra.mxu1 %v3810_v55 }
  0x73   :  { %2808 = vmatprep.subr.bf16.mxu1 %v4348_v0  ;;  %2785 = vmatpush1.bf16.msra.mxu0 %v3905_v35 }
  0x74   :  { %2787 = vmatprep.subr.bf16.mxu0 %v3908_v36 }
  0x76   :  { %2810 = vmatpush3.bf16.msra.mxu1 %v3820_v2 }
  0x77   :  { %2811 = vmatprep.subr.bf16.mxu1 %v4348_v0  ;;  %2789 = vmatpush1.bf16.msra.mxu0 %v3913_v44 }
  0x78   :  { %2815 = vmatprep.subr.bf16.mxu0 %v3762_v10 }
  0x7a   :  { %2813 = vmatpush3.bf16.msra.mxu1 %v3833_v18  ;;  %377 = vmatmul.mubr.f32.vlgmr.msra.gmra.mrb[2].mxu0 %v3684_v1 }
  0x7b   :  { %2847 = vmatprep.subr.bf16.mxu1 %v3836_v20  ;;  %2817 = vmatpush1.bf16.msra.mxu0 %v3764_v11 }
  0x7c   :  { %563 = vmatprep.mubr.f32.mxu0 %v3684_v1  ;;  %2819 = vmatprep.subr.bf16.mxu0 %v3771_v19 }
  0x7f   :  { %2821 = vmatpush1.bf16.msra.mxu0 %v3774_v23 }
  0x80   :  { %2823 = vmatprep.subr.bf16.mxu0 %v3777_v25 }
  0x83   :  { %2825 = vmatpush1.bf16.msra.mxu0 %v3784_v33 }
  0x84   :  { %2827 = vmatprep.subr.bf16.mxu0 %v3787_v34 }
  0x87   :  { %2829 = vmatpush1.bf16.msra.mxu0 %v3794_v42 }
  0x88   :  { %2831 = vmatprep.subr.bf16.mxu0 %v3797_v43 }
  0x8b   :  { %2833 = vmatpush1.bf16.msra.mxu0 %v3804_v51 }
  0x8c   :  { %2835 = vmatprep.subr.bf16.mxu0 %v3807_v52 }
  0x8f   :  { %2837 = vmatpush1.bf16.msra.mxu0 %v3814_v60 }
  0x90   :  { %2839 = vmatprep.subr.bf16.mxu0 %v3817_v61 }
  0x93   :  { %2841 = vmatpush1.bf16.msra.mxu0 %v3824_v8 }
  0x94   :  { %2843 = vmatprep.subr.bf16.mxu0 %v3827_v13 }
  0x97   :  { %2845 = vmatpush1.bf16.msra.mxu0 %v3842_v26 }
  0x98   :  { %2878 = vmatprep.subr.bf16.mxu0 %v4348_v0 }
  0xcc   :  { %v237_v14 = vpop.permute.xlu0 %236 }
 0x12d   :  { %v228_v45 = vpop.f32.mrb[0].mxu0 }
 0x12e   :  { %v2456_v48 = vpop.f32.mrb[1].mxu0  ;;  %v229_v63 = vadd.f32 %v3943_v57, %v228_v45 }
 0x130   :  { %v307_v49 = vpop.f32.mrb[0].mxu1 }
 0x131   :  { %v308_v54 = vadd.f32 %v307_v49, %v151_v47  ;;  %v309_v56 = vpop.f32.mrb[1].mxu1 }
 0x132   :  { %v310_v16 = vadd.f32 %v309_v56, %v152_v5 }
 0x133   :  { %v2247_v58 = vmul.f32 -1.442695, %v308_v54  ;;  %v153_v54 = vld [vmem:[#allocation4 + $0x10] sm:$0xff] }
 0x134   :  { %v2248_v27 = vmul.f32 -1.442695, %v310_v16 }
 0x135   :  { %3420 = vpow2.f32 %v2247_v58 }
 0x136   :  { %3422 = vtanh.f32 %v229_v63 }
 0x13f   :  { %v3421_v3 = vpop.eup %3420 }
 0x140   :  { %v386_v4 = vadd.f32 1.0, %v3421_v3  ;;  %v3423_v12 = vpop.eup %3422 }
 0x141   :  { %v233_v17 = vsub.f32 0.0, %v3423_v12  ;;  %v239_v24 = vmul.f32 %v3423_v12, %v237_v14 }
 0x142   :  { %3424 = vrcp.f32 %v386_v4 }
 0x143   :  { %v240_v29 = vadd.f32 %v239_v24, %v233_v17  ;;  %3426 = vpow2.f32 %v2248_v27 }
 0x14c   :  { %v3425_v32 = vpop.eup %3424 }
 0x14d   :  { %v407_v38 = vmul.f32 %v3425_v32, %v240_v29  ;;  %v378_v47 = vpop.f32.mrb[2].mxu0  ;;  %v3427_v63 = vpop.eup %3426  ;;  %v4350_v32 = vmov 0.0|0.0  }
 0x14e   :  { %v380_v48 = vpop.f32.mrb[3].mxu0  ;;  %v379_v58 = vadd.f32 %v378_v47, %v153_v54  ;;  %v392_v4 = vadd.f32 1.0, %v3427_v63  ;;  %v2271_v47 = vld [vmem:[%s4343_s1 + $0x28] sm:$0xff]  ;;  %v414_v54 = vld [vmem:[#allocation4 + $0x20] sm:$0xff] }
 0x14f   :  { %v381_v49 = vadd.f32 %v380_v48, %v154_v39  ;;  %v2261_v39 = vld [vmem:[%s4343_s1 + $0x18] sm:$0xff] }
 0x150   :  { %v2249_v3 = vmul.f32 -1.442695, %v379_v58  ;;  %v2281_v48 = vld [vmem:[%s4343_s1 + $0x38] sm:$0xff] }
 0x151   :  { %v2250_v45 = vmul.f32 -1.442695, %v381_v49 }
 0x153   :  { %3428 = vpow2.f32 %v2250_v45 }
 0x154   :  { %3430 = vpow2.f32 %v2249_v3 }
 0x155   :  { %3432 = vrcp.f32 %v392_v4 }
 0x15d   :  { %v3429_v0 = vpop.eup %3428 }
 0x15e   :  { %v404_v56 = vadd.f32 1.0, %v3429_v0  ;;  %v3431_v5 = vpop.eup %3430 }
 0x15f   :  { %v3433_v12 = vpop.eup %3432  ;;  %v398_v16 = vadd.f32 1.0, %v3431_v5  ;;  %v415_v5 = vld [vmem:[#allocation4 + $0x28] sm:$0xff] }
 0x160   :  { %3434 = vrcp.f32 %v404_v56 }
 0x161   :  { %3436 = vrcp.f32 %v398_v16 }
 0x16a   :  { %v3435_v14 = vpop.eup %3434 }
 0x16b   :  { %v408_v17 = vmul.f32 %v3435_v14, %v3433_v12  ;;  %v3437_v0 = vpop.eup %3436 }
 0x16d   :  { %v3946_v24 = vadd.f32 %v408_v17, %v407_v38  ;;  %v2256_v38 = vld [vmem:[%s4343_s1 + $0x10] sm:$0xff] }
 0x16e   :  { %753 = vperm.xlu1 %3419, %v2256_v38  }
 0x16f   :  { %3438 = vtanh.f32 %v3946_v24  ;;  %2490 = vmatmul.mubr.f32.vlgmr.msra.gmra.mrb[2].mxu1 %v3946_v24 }
 0x170   :  { %2849 = vmatpush1.bf16.msra.mxu1 %v3846_v30  ;;  %634 = vmatprep.mubr.f32.mxu1 %v3684_v1 }
 0x171   :  { %2851 = vmatprep.subr.bf16.mxu1 %v3849_v31 }
 0x172   :  { %1012 = vperm.xlu1 %3419, %v2261_v39  }
 0x174   :  { %2853 = vmatpush1.bf16.msra.mxu1 %v3858_v40 }
 0x175   :  { %2855 = vmatprep.subr.bf16.mxu1 %v3863_v41 }
 0x176   :  { %1530 = vperm.xlu1 %3419, %v2271_v47   ;;  %v495_v47 = vpop.permute.xlu0 %494 }
 0x178   :  { %2857 = vmatpush1.bf16.msra.mxu1 %v3873_v50 }
 0x179   :  { %v3439_v27 = vpop.eup %3438  ;;  %2859 = vmatprep.subr.bf16.mxu1 %v3876_v53 }
 0x17a   :  { %v411_v29 = vmul.f32 %v3439_v27, %v3437_v0  ;;  %2048 = vperm.xlu1 %3419, %v2281_v48   ;;  %v417_v0 = vld [vmem:[#allocation4 + $0x38] sm:$0xff] }
 0x17c   :  { %2861 = vmatpush1.bf16.msra.mxu1 %v3881_v59  ;;  %412 = vst [vmem:[#allocation10] sm:$0xff] %v411_v29  ;;  %564 = vmatmul.mubr.f32.vlgmr.msra.gmra.mrb[4].mxu0 %v411_v29 }
 0x17d   :  { %2863 = vmatprep.subr.bf16.mxu1 %v3884_v62  ;;  %2880 = vmatpush3.bf16.msra.mxu0 %v3760_v6 }
 0x17e   :  { %2881 = vmatprep.subr.bf16.mxu0 %v4350_v32  ;;  %2524 = vmatprep.mubr.msk.f32.mxu0 %vm3683_vm0, %v3684_v1 }
 0x180   :  { %2865 = vmatpush1.bf16.msra.mxu1 %v3889_v7 }
 0x181   :  { %2867 = vmatprep.subr.bf16.mxu1 %v3892_v9  ;;  %2883 = vmatpush3.bf16.msra.mxu0 %v3767_v15 }
 0x182   :  { %2884 = vmatprep.subr.bf16.mxu0 %v4350_v32 }
 0x184   :  { %2869 = vmatpush1.bf16.msra.mxu1 %v3897_v21 }
 0x185   :  { %2871 = vmatprep.subr.bf16.mxu1 %v3900_v22  ;;  %2886 = vmatpush3.bf16.msra.mxu0 %v3780_v28 }
 0x186   :  { %2887 = vmatprep.subr.bf16.mxu0 %v4350_v32 }
 0x188   :  { %2873 = vmatpush1.bf16.msra.mxu1 %v3905_v35 }
 0x189   :  { %2875 = vmatprep.subr.bf16.mxu1 %v3908_v36  ;;  %2889 = vmatpush3.bf16.msra.mxu0 %v3790_v37 }
 0x18a   :  { %2890 = vmatprep.subr.bf16.mxu0 %v4350_v32 }
 0x18c   :  { %2877 = vmatpush1.bf16.msra.mxu1 %v3913_v44 }
 0x18d   :  { %2903 = vmatprep.subr.bf16.mxu1 %v3762_v10  ;;  %2892 = vmatpush3.bf16.msra.mxu0 %v3800_v46 }
 0x18e   :  { %2893 = vmatprep.subr.bf16.mxu0 %v4350_v32 }
 0x18f   :  { %635 = vmatmul.mubr.f32.vlgmr.msra.gmra.mrb[4].mxu1 %v411_v29 }
 0x190   :  { %2905 = vmatpush1.bf16.msra.mxu1 %v3764_v11  ;;  %822 = vmatprep.mubr.f32.mxu1 %v3684_v1 }
 0x191   :  { %2907 = vmatprep.subr.bf16.mxu1 %v3771_v19  ;;  %2895 = vmatpush3.bf16.msra.mxu0 %v3810_v55 }
 0x192   :  { %2896 = vmatprep.subr.bf16.mxu0 %v4350_v32 }
 0x194   :  { %2909 = vmatpush1.bf16.msra.mxu1 %v3774_v23 }
 0x195   :  { %2911 = vmatprep.subr.bf16.mxu1 %v3777_v25  ;;  %2898 = vmatpush3.bf16.msra.mxu0 %v3820_v2 }
 0x196   :  { %2899 = vmatprep.subr.bf16.mxu0 %v4350_v32 }
 0x198   :  { %2913 = vmatpush1.bf16.msra.mxu1 %v3784_v33 }
 0x199   :  { %2915 = vmatprep.subr.bf16.mxu1 %v3787_v34  ;;  %2901 = vmatpush3.bf16.msra.mxu0 %v3833_v18 }
 0x19a   :  { %2935 = vmatprep.subr.bf16.mxu0 %v3836_v20 }
 0x19c   :  { %2917 = vmatpush1.bf16.msra.mxu1 %v3794_v42 }
 0x19d   :  { %2919 = vmatprep.subr.bf16.mxu1 %v3797_v43 }
 0x1a0   :  { %2921 = vmatpush1.bf16.msra.mxu1 %v3804_v51 }
 0x1a1   :  { %2923 = vmatprep.subr.bf16.mxu1 %v3807_v52 }
 0x1a4   :  { %2925 = vmatpush1.bf16.msra.mxu1 %v3814_v60 }
 0x1a5   :  { %2927 = vmatprep.subr.bf16.mxu1 %v3817_v61 }
 0x1a8   :  { %2929 = vmatpush1.bf16.msra.mxu1 %v3824_v8 }
 0x1a9   :  { %2931 = vmatprep.subr.bf16.mxu1 %v3827_v13 }
 0x1ac   :  { %2933 = vmatpush1.bf16.msra.mxu1 %v3842_v26 }
 0x1ad   :  { %2966 = vmatprep.subr.bf16.mxu1 %v4350_v32 }
 0x242   :  { %v486_v49 = vpop.f32.mrb[2].mxu1 }
 0x243   :  { %v2491_v45 = vpop.f32.mrb[3].mxu1  ;;  %v487_v56 = vadd.f32 %v3943_v57, %v486_v49 }
 0x24f   :  { %v565_v58 = vpop.f32.mrb[4].mxu0 }
 0x250   :  { %v566_v63 = vadd.f32 %v565_v58, %v414_v54  ;;  %v567_v3 = vpop.f32.mrb[5].mxu0  ;;  %v416_v58 = vld [vmem:[#allocation4 + $0x30] sm:$0xff] }
 0x251   :  { %v568_v12 = vadd.f32 %v567_v3, %v415_v5 }
 0x252   :  { %v2252_v4 = vmul.f32 -1.442695, %v566_v63 }
 0x253   :  { %v2253_v17 = vmul.f32 -1.442695, %v568_v12 }
 0x254   :  { %3440 = vpow2.f32 %v2252_v4 }
 0x255   :  { %3442 = vtanh.f32 %v487_v56 }
 0x25e   :  { %v3441_v14 = vpop.eup %3440 }
 0x25f   :  { %v644_v16 = vadd.f32 1.0, %v3441_v14  ;;  %v3443_v29 = vpop.eup %3442 }
 0x260   :  { %v491_v48 = vsub.f32 %v3946_v24, %v3443_v29  ;;  %v497_v45 = vmul.f32 %v3443_v29, %v495_v47 }
 0x261   :  { %3444 = vrcp.f32 %v644_v16 }
 0x262   :  { %v636_v27 = vpop.f32.mrb[4].mxu1  ;;  %3446 = vpow2.f32 %v2253_v17  ;;  %v498_v63 = vadd.f32 %v497_v45, %v491_v48 }
 0x263   :  { %v638_v38 = vpop.f32.mrb[5].mxu1  ;;  %v637_v49 = vadd.f32 %v636_v27, %v416_v58  ;;  %v673_v58 = vld [vmem:[#allocation4 + $0x40] sm:$0xff] }
 0x264   :  { %v639_v39 = vadd.f32 %v638_v38, %v417_v0 }
 0x265   :  { %v2254_v5 = vmul.f32 -1.442695, %v637_v49 }
 0x266   :  { %v2255_v54 = vmul.f32 -1.442695, %v639_v39 }
 0x268   :  { %3448 = vpow2.f32 %v2255_v54 }
 0x269   :  { %3450 = vpow2.f32 %v2254_v5  ;;  %v674_v5 = vld [vmem:[#allocation4 + $0x48] sm:$0xff] }
 0x26b   :  { %v3445_v3 = vpop.eup %3444 }
 0x26c   :  { %v665_v4 = vmul.f32 %v3445_v3, %v498_v63  ;;  %v3447_v56 = vpop.eup %3446 }
 0x26d   :  { %v650_v12 = vadd.f32 1.0, %v3447_v56 }
 0x26f   :  { %3452 = vrcp.f32 %v650_v12 }
 0x272   :  { %v3449_v14 = vpop.eup %3448 }
 0x273   :  { %v662_v16 = vadd.f32 1.0, %v3449_v14  ;;  %v3451_v17 = vpop.eup %3450 }
 0x274   :  { %v656_v24 = vadd.f32 1.0, %v3451_v17 }
 0x275   :  { %3454 = vrcp.f32 %v662_v16 }
 0x276   :  { %3456 = vrcp.f32 %v656_v24 }
 0x279   :  { %v3453_v0 = vpop.eup %3452 }
 0x27f   :  { %v3455_v38 = vpop.eup %3454 }
 0x280   :  { %v666_v29 = vmul.f32 %v3455_v38, %v3453_v0  ;;  %v3457_v27 = vpop.eup %3456  ;;  %v676_v0 = vld [vmem:[#allocation4 + $0x58] sm:$0xff] }
 0x282   :  { %v4016_v39 = vadd.f32 %v666_v29, %v665_v4  ;;  %v754_v29 = vpop.permute.xlu1 %753 }
 0x284   :  { %3458 = vtanh.f32 %v4016_v39  ;;  %2525 = vmatmul.mubr.f32.vlgmr.msra.gmra.mrb[6].mxu0 %v4016_v39 }
 0x285   :  { %2937 = vmatpush1.bf16.msra.mxu0 %v3846_v30  ;;  %893 = vmatprep.mubr.f32.mxu0 %v3684_v1 }
 0x286   :  { %2939 = vmatprep.subr.bf16.mxu0 %v3849_v31 }
 0x289   :  { %2941 = vmatpush1.bf16.msra.mxu0 %v3858_v40 }
 0x28a   :  { %2943 = vmatprep.subr.bf16.mxu0 %v3863_v41 }
 0x28d   :  { %2945 = vmatpush1.bf16.msra.mxu0 %v3873_v50 }
 0x28e   :  { %v3459_v47 = vpop.eup %3458  ;;  %2947 = vmatprep.subr.bf16.mxu0 %v3876_v53 }
 0x28f   :  { %v669_v48 = vmul.f32 %v3459_v47, %v3457_v27 }
 0x291   :  { %2949 = vmatpush1.bf16.msra.mxu0 %v3881_v59  ;;  %671 = vst [vmem:[#allocation10 + $0x8] sm:$0xff] %v669_v48  ;;  %823 = vmatmul.mubr.f32.vlgmr.msra.gmra.mrb[6].mxu1 %v669_v48 }
 0x292   :  { %2951 = vmatprep.subr.bf16.mxu0 %v3884_v62  ;;  %2968 = vmatpush3.bf16.msra.mxu1 %v3760_v6 }
 0x293   :  { %2969 = vmatprep.subr.bf16.mxu1 %v4350_v32  ;;  %2559 = vmatprep.mubr.msk.f32.mxu1 %vm3683_vm0, %v3684_v1 }
 0x295   :  { %2953 = vmatpush1.bf16.msra.mxu0 %v3889_v7 }
 0x296   :  { %2955 = vmatprep.subr.bf16.mxu0 %v3892_v9  ;;  %2971 = vmatpush3.bf16.msra.mxu1 %v3767_v15 }
 0x297   :  { %2972 = vmatprep.subr.bf16.mxu1 %v4350_v32 }
 0x299   :  { %2957 = vmatpush1.bf16.msra.mxu0 %v3897_v21 }
 0x29a   :  { %2959 = vmatprep.subr.bf16.mxu0 %v3900_v22  ;;  %2974 = vmatpush3.bf16.msra.mxu1 %v3780_v28 }
 0x29b   :  { %2975 = vmatprep.subr.bf16.mxu1 %v4350_v32 }
 0x29d   :  { %2961 = vmatpush1.bf16.msra.mxu0 %v3905_v35 }
 0x29e   :  { %2963 = vmatprep.subr.bf16.mxu0 %v3908_v36  ;;  %2977 = vmatpush3.bf16.msra.mxu1 %v3790_v37 }
 0x29f   :  { %2978 = vmatprep.subr.bf16.mxu1 %v4350_v32 }
 0x2a1   :  { %2965 = vmatpush1.bf16.msra.mxu0 %v3913_v44 }
 0x2a2   :  { %2991 = vmatprep.subr.bf16.mxu0 %v3762_v10  ;;  %2980 = vmatpush3.bf16.msra.mxu1 %v3800_v46 }
 0x2a3   :  { %2981 = vmatprep.subr.bf16.mxu1 %v4350_v32 }
 0x2a4   :  { %894 = vmatmul.mubr.f32.vlgmr.msra.gmra.mrb[8].mxu0 %v669_v48 }
 0x2a5   :  { %2993 = vmatpush1.bf16.msra.mxu0 %v3764_v11  ;;  %1081 = vmatprep.mubr.f32.mxu0 %v3684_v1 }
 0x2a6   :  { %2995 = vmatprep.subr.bf16.mxu0 %v3771_v19  ;;  %2983 = vmatpush3.bf16.msra.mxu1 %v3810_v55 }
 0x2a7   :  { %2984 = vmatprep.subr.bf16.mxu1 %v4350_v32 }
 0x2a9   :  { %2997 = vmatpush1.bf16.msra.mxu0 %v3774_v23 }
 0x2aa   :  { %2999 = vmatprep.subr.bf16.mxu0 %v3777_v25  ;;  %2986 = vmatpush3.bf16.msra.mxu1 %v3820_v2 }
 0x2ab   :  { %2987 = vmatprep.subr.bf16.mxu1 %v4350_v32 }
 0x2ad   :  { %3001 = vmatpush1.bf16.msra.mxu0 %v3784_v33 }
 0x2ae   :  { %3003 = vmatprep.subr.bf16.mxu0 %v3787_v34  ;;  %2989 = vmatpush3.bf16.msra.mxu1 %v3833_v18 }
 0x2af   :  { %3023 = vmatprep.subr.bf16.mxu1 %v3836_v20 }
 0x2b1   :  { %3005 = vmatpush1.bf16.msra.mxu0 %v3794_v42 }
 0x2b2   :  { %3007 = vmatprep.subr.bf16.mxu0 %v3797_v43 }
 0x2b5   :  { %3009 = vmatpush1.bf16.msra.mxu0 %v3804_v51 }
 0x2b6   :  { %3011 = vmatprep.subr.bf16.mxu0 %v3807_v52 }
 0x2b9   :  { %3013 = vmatpush1.bf16.msra.mxu0 %v3814_v60 }
 0x2ba   :  { %3015 = vmatprep.subr.bf16.mxu0 %v3817_v61 }
 0x2bd   :  { %3017 = vmatpush1.bf16.msra.mxu0 %v3824_v8 }
 0x2be   :  { %3019 = vmatprep.subr.bf16.mxu0 %v3827_v13 }
 0x2c1   :  { %3021 = vmatpush1.bf16.msra.mxu0 %v3842_v26 }
 0x2c2   :  { %3054 = vmatprep.subr.bf16.mxu0 %v4350_v32 }
 0x357   :  { %v745_v45 = vpop.f32.mrb[6].mxu0 }
 0x358   :  { %v2526_v54 = vpop.f32.mrb[7].mxu0  ;;  %v746_v56 = vadd.f32 %v3943_v57, %v745_v45 }
 0x364   :  { %v824_v49 = vpop.f32.mrb[6].mxu1 }
 0x365   :  { %v825_v63 = vadd.f32 %v824_v49, %v673_v58  ;;  %v826_v3 = vpop.f32.mrb[7].mxu1  ;;  %v675_v49 = vld [vmem:[#allocation4 + $0x50] sm:$0xff] }
 0x366   :  { %v827_v12 = vadd.f32 %v826_v3, %v674_v5 }
 0x367   :  { %v2257_v4 = vmul.f32 -1.442695, %v825_v63 }
 0x368   :  { %v2258_v17 = vmul.f32 -1.442695, %v827_v12 }
 0x369   :  { %3460 = vpow2.f32 %v2257_v4 }
 0x36a   :  { %3462 = vtanh.f32 %v746_v56 }
 0x373   :  { %v3461_v14 = vpop.eup %3460 }
 0x374   :  { %v903_v16 = vadd.f32 1.0, %v3461_v14  ;;  %v3463_v24 = vpop.eup %3462 }
 0x375   :  { %v750_v48 = vsub.f32 %v4016_v39, %v3463_v24  ;;  %v756_v54 = vmul.f32 %v3463_v24, %v754_v29 }
 0x376   :  { %3464 = vrcp.f32 %v903_v16 }
 0x377   :  { %v895_v38 = vpop.f32.mrb[8].mxu0  ;;  %3466 = vpow2.f32 %v2258_v17  ;;  %v757_v45 = vadd.f32 %v756_v54, %v750_v48 }
 0x378   :  { %v897_v27 = vpop.f32.mrb[9].mxu0  ;;  %v896_v63 = vadd.f32 %v895_v38, %v675_v49  ;;  %v932_v49 = vld [vmem:[#allocation4 + $0x60] sm:$0xff] }
 0x379   :  { %v898_v47 = vadd.f32 %v897_v27, %v676_v0 }
 0x37a   :  { %v2259_v5 = vmul.f32 -1.442695, %v896_v63 }
 0x37b   :  { %v2260_v58 = vmul.f32 -1.442695, %v898_v47 }
 0x37d   :  { %3468 = vpow2.f32 %v2260_v58 }
 0x37e   :  { %3470 = vpow2.f32 %v2259_v5  ;;  %v933_v5 = vld [vmem:[#allocation4 + $0x68] sm:$0xff] }
 0x380   :  { %v3465_v3 = vpop.eup %3464 }
 0x381   :  { %v924_v4 = vmul.f32 %v3465_v3, %v757_v45  ;;  %v3467_v56 = vpop.eup %3466 }
 0x382   :  { %v909_v12 = vadd.f32 1.0, %v3467_v56 }
 0x384   :  { %3472 = vrcp.f32 %v909_v12 }
 0x387   :  { %v3469_v14 = vpop.eup %3468 }
 0x388   :  { %v921_v16 = vadd.f32 1.0, %v3469_v14  ;;  %v3471_v17 = vpop.eup %3470 }
 0x389   :  { %v915_v39 = vadd.f32 1.0, %v3471_v17 }
 0x38a   :  { %3474 = vrcp.f32 %v921_v16 }
 0x38b   :  { %3476 = vrcp.f32 %v915_v39 }
 0x38e   :  { %v3473_v0 = vpop.eup %3472 }
 0x394   :  { %v3475_v27 = vpop.eup %3474 }
 0x395   :  { %v925_v24 = vmul.f32 %v3475_v27, %v3473_v0  ;;  %v3477_v38 = vpop.eup %3476  ;;  %v935_v0 = vld [vmem:[#allocation4 + $0x78] sm:$0xff] }
 0x397   :  { %v4074_v29 = vadd.f32 %v925_v24, %v924_v4 }
 0x399   :  { %3478 = vtanh.f32 %v4074_v29  ;;  %2560 = vmatmul.mubr.f32.vlgmr.msra.gmra.mrb[8].mxu1 %v4074_v29 }
 0x39a   :  { %3025 = vmatpush1.bf16.msra.mxu1 %v3846_v30  ;;  %1152 = vmatprep.mubr.f32.mxu1 %v3684_v1 }
 0x39b   :  { %3027 = vmatprep.subr.bf16.mxu1 %v3849_v31 }
 0x39e   :  { %3029 = vmatpush1.bf16.msra.mxu1 %v3858_v40 }
 0x39f   :  { %3031 = vmatprep.subr.bf16.mxu1 %v3863_v41 }
 0x3a2   :  { %3033 = vmatpush1.bf16.msra.mxu1 %v3873_v50 }
 0x3a3   :  { %v3479_v47 = vpop.eup %3478  ;;  %3035 = vmatprep.subr.bf16.mxu1 %v3876_v53 }
 0x3a4   :  { %v928_v48 = vmul.f32 %v3479_v47, %v3477_v38  ;;  %v1013_v47 = vpop.permute.xlu1 %1012 }
 0x3a6   :  { %3037 = vmatpush1.bf16.msra.mxu1 %v3881_v59  ;;  %930 = vst [vmem:[#allocation10 + $0x10] sm:$0xff] %v928_v48  ;;  %1082 = vmatmul.mubr.f32.vlgmr.msra.gmra.mrb[10].mxu0 %v928_v48 }
 0x3a7   :  { %3039 = vmatprep.subr.bf16.mxu1 %v3884_v62  ;;  %3056 = vmatpush3.bf16.msra.mxu0 %v3760_v6 }
 0x3a8   :  { %3057 = vmatprep.subr.bf16.mxu0 %v4350_v32  ;;  %2594 = vmatprep.mubr.msk.f32.mxu0 %vm3683_vm0, %v3684_v1 }
 0x3aa   :  { %3041 = vmatpush1.bf16.msra.mxu1 %v3889_v7 }
 0x3ab   :  { %3043 = vmatprep.subr.bf16.mxu1 %v3892_v9  ;;  %3059 = vmatpush3.bf16.msra.mxu0 %v3767_v15 }
 0x3ac   :  { %3060 = vmatprep.subr.bf16.mxu0 %v4350_v32 }
 0x3ae   :  { %3045 = vmatpush1.bf16.msra.mxu1 %v3897_v21 }
 0x3af   :  { %3047 = vmatprep.subr.bf16.mxu1 %v3900_v22  ;;  %3062 = vmatpush3.bf16.msra.mxu0 %v3780_v28 }
 0x3b0   :  { %3063 = vmatprep.subr.bf16.mxu0 %v4350_v32 }
 0x3b2   :  { %3049 = vmatpush1.bf16.msra.mxu1 %v3905_v35 }
 0x3b3   :  { %3051 = vmatprep.subr.bf16.mxu1 %v3908_v36  ;;  %3065 = vmatpush3.bf16.msra.mxu0 %v3790_v37 }
 0x3b4   :  { %3066 = vmatprep.subr.bf16.mxu0 %v4350_v32 }
 0x3b6   :  { %3053 = vmatpush1.bf16.msra.mxu1 %v3913_v44 }
 0x3b7   :  { %3079 = vmatprep.subr.bf16.mxu1 %v3762_v10  ;;  %3068 = vmatpush3.bf16.msra.mxu0 %v3800_v46 }
 0x3b8   :  { %3069 = vmatprep.subr.bf16.mxu0 %v4350_v32 }
 0x3b9   :  { %1153 = vmatmul.mubr.f32.vlgmr.msra.gmra.mrb[10].mxu1 %v928_v48 }
 0x3ba   :  { %3081 = vmatpush1.bf16.msra.mxu1 %v3764_v11  ;;  %1340 = vmatprep.mubr.f32.mxu1 %v3684_v1 }
 0x3bb   :  { %3083 = vmatprep.subr.bf16.mxu1 %v3771_v19  ;;  %3071 = vmatpush3.bf16.msra.mxu0 %v3810_v55 }
 0x3bc   :  { %3072 = vmatprep.subr.bf16.mxu0 %v4350_v32 }
 0x3be   :  { %3085 = vmatpush1.bf16.msra.mxu1 %v3774_v23 }
 0x3bf   :  { %3087 = vmatprep.subr.bf16.mxu1 %v3777_v25  ;;  %3074 = vmatpush3.bf16.msra.mxu0 %v3820_v2 }
 0x3c0   :  { %3075 = vmatprep.subr.bf16.mxu0 %v4350_v32 }
 0x3c2   :  { %3089 = vmatpush1.bf16.msra.mxu1 %v3784_v33 }
 0x3c3   :  { %3091 = vmatprep.subr.bf16.mxu1 %v3787_v34  ;;  %3077 = vmatpush3.bf16.msra.mxu0 %v3833_v18 }
 0x3c4   :  { %3111 = vmatprep.subr.bf16.mxu0 %v3836_v20 }
 0x3c6   :  { %3093 = vmatpush1.bf16.msra.mxu1 %v3794_v42 }
 0x3c7   :  { %3095 = vmatprep.subr.bf16.mxu1 %v3797_v43 }
 0x3ca   :  { %3097 = vmatpush1.bf16.msra.mxu1 %v3804_v51 }
 0x3cb   :  { %3099 = vmatprep.subr.bf16.mxu1 %v3807_v52 }
 0x3ce   :  { %3101 = vmatpush1.bf16.msra.mxu1 %v3814_v60 }
 0x3cf   :  { %3103 = vmatprep.subr.bf16.mxu1 %v3817_v61 }
 0x3d2   :  { %3105 = vmatpush1.bf16.msra.mxu1 %v3824_v8 }
 0x3d3   :  { %3107 = vmatprep.subr.bf16.mxu1 %v3827_v13 }
 0x3d6   :  { %3109 = vmatpush1.bf16.msra.mxu1 %v3842_v26 }
 0x3d7   :  { %3142 = vmatprep.subr.bf16.mxu1 %v4350_v32 }
 0x46c   :  { %v1004_v54 = vpop.f32.mrb[8].mxu1 }
 0x46d   :  { %v2561_v58 = vpop.f32.mrb[9].mxu1  ;;  %v1005_v56 = vadd.f32 %v3943_v57, %v1004_v54 }
 0x479   :  { %v1083_v45 = vpop.f32.mrb[10].mxu0 }
 0x47a   :  { %v1084_v63 = vadd.f32 %v1083_v45, %v932_v49  ;;  %v1085_v3 = vpop.f32.mrb[11].mxu0  ;;  %v934_v45 = vld [vmem:[#allocation4 + $0x70] sm:$0xff] }
 0x47b   :  { %v1086_v12 = vadd.f32 %v1085_v3, %v933_v5 }
 0x47c   :  { %v2262_v4 = vmul.f32 -1.442695, %v1084_v63 }
 0x47d   :  { %v2263_v17 = vmul.f32 -1.442695, %v1086_v12 }
 0x47e   :  { %3480 = vpow2.f32 %v2262_v4 }
 0x47f   :  { %3482 = vtanh.f32 %v1005_v56 }
 0x488   :  { %v3481_v14 = vpop.eup %3480 }
 0x489   :  { %v1162_v16 = vadd.f32 1.0, %v3481_v14  ;;  %v3483_v39 = vpop.eup %3482 }
 0x48a   :  { %v1009_v48 = vsub.f32 %v4074_v29, %v3483_v39  ;;  %v1015_v58 = vmul.f32 %v3483_v39, %v1013_v47 }
 0x48b   :  { %3484 = vrcp.f32 %v1162_v16 }
 0x48c   :  { %v1154_v27 = vpop.f32.mrb[10].mxu1  ;;  %3486 = vpow2.f32 %v2263_v17  ;;  %v1016_v63 = vadd.f32 %v1015_v58, %v1009_v48 }
 0x48d   :  { %v1156_v24 = vpop.f32.mrb[11].mxu1  ;;  %v1155_v54 = vadd.f32 %v1154_v27, %v934_v45  ;;  %v1191_v45 = vld [vmem:[#allocation4 + $0x80] sm:$0xff] }
 0x48e   :  { %v1157_v38 = vadd.f32 %v1156_v24, %v935_v0 }
 0x48f   :  { %v2264_v5 = vmul.f32 -1.442695, %v1155_v54 }
 0x490   :  { %v2265_v49 = vmul.f32 -1.442695, %v1157_v38 }
 0x492   :  { %3488 = vpow2.f32 %v2265_v49 }
 0x493   :  { %3490 = vpow2.f32 %v2264_v5  ;;  %v1192_v5 = vld [vmem:[#allocation4 + $0x88] sm:$0xff] }
 0x495   :  { %v3485_v3 = vpop.eup %3484 }
 0x496   :  { %v1183_v4 = vmul.f32 %v3485_v3, %v1016_v63  ;;  %v3487_v56 = vpop.eup %3486 }
 0x497   :  { %v1168_v12 = vadd.f32 1.0, %v3487_v56 }
 0x499   :  { %3492 = vrcp.f32 %v1168_v12 }
 0x49c   :  { %v3489_v14 = vpop.eup %3488 }
 0x49d   :  { %v1180_v16 = vadd.f32 1.0, %v3489_v14  ;;  %v3491_v17 = vpop.eup %3490 }
 0x49e   :  { %v1174_v29 = vadd.f32 1.0, %v3491_v17 }
 0x49f   :  { %3494 = vrcp.f32 %v1180_v16 }
 0x4a0   :  { %3496 = vrcp.f32 %v1174_v29 }
 0x4a3   :  { %v3493_v0 = vpop.eup %3492 }
 0x4a9   :  { %v3495_v24 = vpop.eup %3494 }
 0x4aa   :  { %v1184_v39 = vmul.f32 %v3495_v24, %v3493_v0  ;;  %v3497_v27 = vpop.eup %3496  ;;  %v1194_v0 = vld [vmem:[#allocation4 + $0x98] sm:$0xff] }
 0x4ac   :  { %v4132_v38 = vadd.f32 %v1184_v39, %v1183_v4 }
 0x4ae   :  { %3498 = vtanh.f32 %v4132_v38  ;;  %2595 = vmatmul.mubr.f32.vlgmr.msra.gmra.mrb[12].mxu0 %v4132_v38 }
 0x4af   :  { %3113 = vmatpush1.bf16.msra.mxu0 %v3846_v30  ;;  %1411 = vmatprep.mubr.f32.mxu0 %v3684_v1 }
 0x4b0   :  { %3115 = vmatprep.subr.bf16.mxu0 %v3849_v31 }
 0x4b3   :  { %3117 = vmatpush1.bf16.msra.mxu0 %v3858_v40 }
 0x4b4   :  { %3119 = vmatprep.subr.bf16.mxu0 %v3863_v41 }
 0x4b7   :  { %3121 = vmatpush1.bf16.msra.mxu0 %v3873_v50 }
 0x4b8   :  { %v3499_v47 = vpop.eup %3498  ;;  %3123 = vmatprep.subr.bf16.mxu0 %v3876_v53 }
 0x4b9   :  { %v1187_v48 = vmul.f32 %v3499_v47, %v3497_v27  ;;  %v1272_v47 = vpop.permute.xlu0 %1271 }
 0x4bb   :  { %3125 = vmatpush1.bf16.msra.mxu0 %v3881_v59  ;;  %1189 = vst [vmem:[#allocation10 + $0x18] sm:$0xff] %v1187_v48  ;;  %1341 = vmatmul.mubr.f32.vlgmr.msra.gmra.mrb[12].mxu1 %v1187_v48 }
 0x4bc   :  { %3127 = vmatprep.subr.bf16.mxu0 %v3884_v62  ;;  %3144 = vmatpush3.bf16.msra.mxu1 %v3760_v6 }
 0x4bd   :  { %3145 = vmatprep.subr.bf16.mxu1 %v4350_v32  ;;  %2629 = vmatprep.mubr.msk.f32.mxu1 %vm3683_vm0, %v3684_v1 }
 0x4bf   :  { %3129 = vmatpush1.bf16.msra.mxu0 %v3889_v7 }
 0x4c0   :  { %3131 = vmatprep.subr.bf16.mxu0 %v3892_v9  ;;  %3147 = vmatpush3.bf16.msra.mxu1 %v3767_v15 }
 0x4c1   :  { %3148 = vmatprep.subr.bf16.mxu1 %v4350_v32 }
 0x4c3   :  { %3133 = vmatpush1.bf16.msra.mxu0 %v3897_v21 }
 0x4c4   :  { %3135 = vmatprep.subr.bf16.mxu0 %v3900_v22  ;;  %3150 = vmatpush3.bf16.msra.mxu1 %v3780_v28 }
 0x4c5   :  { %3151 = vmatprep.subr.bf16.mxu1 %v4350_v32 }
 0x4c7   :  { %3137 = vmatpush1.bf16.msra.mxu0 %v3905_v35 }
 0x4c8   :  { %3139 = vmatprep.subr.bf16.mxu0 %v3908_v36  ;;  %3153 = vmatpush3.bf16.msra.mxu1 %v3790_v37 }
 0x4c9   :  { %3154 = vmatprep.subr.bf16.mxu1 %v4350_v32 }
 0x4cb   :  { %3141 = vmatpush1.bf16.msra.mxu0 %v3913_v44 }
 0x4cc   :  { %3167 = vmatprep.subr.bf16.mxu0 %v3762_v10  ;;  %3156 = vmatpush3.bf16.msra.mxu1 %v3800_v46 }
 0x4cd   :  { %3157 = vmatprep.subr.bf16.mxu1 %v4350_v32 }
 0x4ce   :  { %1412 = vmatmul.mubr.f32.vlgmr.msra.gmra.mrb[14].mxu0 %v1187_v48 }
 0x4cf   :  { %3169 = vmatpush1.bf16.msra.mxu0 %v3764_v11  ;;  %1599 = vmatprep.mubr.f32.mxu0 %v3684_v1 }
 0x4d0   :  { %3171 = vmatprep.subr.bf16.mxu0 %v3771_v19  ;;  %3159 = vmatpush3.bf16.msra.mxu1 %v3810_v55 }
 0x4d1   :  { %3160 = vmatprep.subr.bf16.mxu1 %v4350_v32 }
 0x4d3   :  { %3173 = vmatpush1.bf16.msra.mxu0 %v3774_v23 }
 0x4d4   :  { %3175 = vmatprep.subr.bf16.mxu0 %v3777_v25  ;;  %3162 = vmatpush3.bf16.msra.mxu1 %v3820_v2 }
 0x4d5   :  { %3163 = vmatprep.subr.bf16.mxu1 %v4350_v32 }
 0x4d7   :  { %3177 = vmatpush1.bf16.msra.mxu0 %v3784_v33 }
 0x4d8   :  { %3179 = vmatprep.subr.bf16.mxu0 %v3787_v34  ;;  %3165 = vmatpush3.bf16.msra.mxu1 %v3833_v18 }
 0x4d9   :  { %3199 = vmatprep.subr.bf16.mxu1 %v3836_v20 }
 0x4db   :  { %3181 = vmatpush1.bf16.msra.mxu0 %v3794_v42 }
 0x4dc   :  { %3183 = vmatprep.subr.bf16.mxu0 %v3797_v43 }
 0x4df   :  { %3185 = vmatpush1.bf16.msra.mxu0 %v3804_v51 }
 0x4e0   :  { %3187 = vmatprep.subr.bf16.mxu0 %v3807_v52 }
 0x4e3   :  { %3189 = vmatpush1.bf16.msra.mxu0 %v3814_v60 }
 0x4e4   :  { %3191 = vmatprep.subr.bf16.mxu0 %v3817_v61 }
 0x4e7   :  { %3193 = vmatpush1.bf16.msra.mxu0 %v3824_v8 }
 0x4e8   :  { %3195 = vmatprep.subr.bf16.mxu0 %v3827_v13 }
 0x4eb   :  { %3197 = vmatpush1.bf16.msra.mxu0 %v3842_v26 }
 0x4ec   :  { %3230 = vmatprep.subr.bf16.mxu0 %v4350_v32 }
 0x581   :  { %v1263_v58 = vpop.f32.mrb[12].mxu0 }
 0x582   :  { %v2596_v49 = vpop.f32.mrb[13].mxu0  ;;  %v1264_v56 = vadd.f32 %v3943_v57, %v1263_v58 }
 0x58e   :  { %v1342_v54 = vpop.f32.mrb[12].mxu1 }
 0x58f   :  { %v1343_v63 = vadd.f32 %v1342_v54, %v1191_v45  ;;  %v1344_v3 = vpop.f32.mrb[13].mxu1  ;;  %v1193_v54 = vld [vmem:[#allocation4 + $0x90] sm:$0xff] }
 0x590   :  { %v1345_v12 = vadd.f32 %v1344_v3, %v1192_v5 }
 0x591   :  { %v2267_v4 = vmul.f32 -1.442695, %v1343_v63 }
 0x592   :  { %v2268_v17 = vmul.f32 -1.442695, %v1345_v12 }
 0x593   :  { %3500 = vpow2.f32 %v2267_v4 }
 0x594   :  { %3502 = vtanh.f32 %v1264_v56 }
 0x59d   :  { %v3501_v14 = vpop.eup %3500 }
 0x59e   :  { %v1421_v16 = vadd.f32 1.0, %v3501_v14  ;;  %v3503_v29 = vpop.eup %3502 }
 0x59f   :  { %v1268_v48 = vsub.f32 %v4132_v38, %v3503_v29  ;;  %v1274_v49 = vmul.f32 %v3503_v29, %v1272_v47 }
 0x5a0   :  { %3504 = vrcp.f32 %v1421_v16 }
 0x5a1   :  { %v1413_v24 = vpop.f32.mrb[14].mxu0  ;;  %3506 = vpow2.f32 %v2268_v17  ;;  %v1275_v58 = vadd.f32 %v1274_v49, %v1268_v48 }
 0x5a2   :  { %v1415_v39 = vpop.f32.mrb[15].mxu0  ;;  %v1414_v57 = vadd.f32 %v1413_v24, %v1193_v54 }
 0x5a3   :  { %v1416_v27 = vadd.f32 %v1415_v39, %v1194_v0 }
 0x5a4   :  { %v2269_v56 = vmul.f32 -1.442695, %v1414_v57 }
 0x5a5   :  { %v2270_v45 = vmul.f32 -1.442695, %v1416_v27 }
 0x5a7   :  { %3508 = vpow2.f32 %v2270_v45  ;;  %v1450_v45 = vld [vmem:[#allocation4 + $0xa0] sm:$0xff] }
 0x5a8   :  { %3510 = vpow2.f32 %v2269_v56  ;;  %v1451_v56 = vld [vmem:[#allocation4 + $0xa8] sm:$0xff] }
 0x5aa   :  { %v3505_v63 = vpop.eup %3504 }
 0x5ab   :  { %v1442_v3 = vmul.f32 %v3505_v63, %v1275_v58  ;;  %v3507_v4 = vpop.eup %3506 }
 0x5ac   :  { %v1427_v5 = vadd.f32 1.0, %v3507_v4 }
 0x5ae   :  { %3512 = vrcp.f32 %v1427_v5 }
 0x5b1   :  { %v3509_v12 = vpop.eup %3508 }
 0x5b2   :  { %v1439_v14 = vadd.f32 1.0, %v3509_v12  ;;  %v3511_v16 = vpop.eup %3510 }
 0x5b3   :  { %v1433_v38 = vadd.f32 1.0, %v3511_v16 }
 0x5b4   :  { %3514 = vrcp.f32 %v1439_v14 }
 0x5b5   :  { %3516 = vrcp.f32 %v1433_v38 }
 0x5b8   :  { %v3513_v17 = vpop.eup %3512 }
 0x5be   :  { %v3515_v0 = vpop.eup %3514 }
 0x5bf   :  { %v1443_v29 = vmul.f32 %v3515_v0, %v3513_v17  ;;  %v3517_v24 = vpop.eup %3516  ;;  %v1453_v17 = vld [vmem:[#allocation4 + $0xb8] sm:$0xff] }
 0x5c1   :  { %v4190_v39 = vadd.f32 %v1443_v29, %v1442_v3  ;;  %v4249_v3 = vld [vmem:[%s4345_s3] ss:$0 sm:$0xff]  ;;  %s3686_s3 = smov [#allocation10]  }
 0x5c2   :  { %s2233_s25 = sshll.u32 %s3686_s3, 4  ;;  %s2234_s25 = int_to_ptr.vmem [resolvable:$true] %s2233_s25 }
 0x5c3   :  { %3518 = vtanh.f32 %v4190_v39  ;;  %2630 = vmatmul.mubr.f32.vlgmr.msra.gmra.mrb[14].mxu1 %v4190_v39  ;;  %s3647_s26 = scalar_lea.vmem %s2234_s25, 1024  ;;  %p3652_p11 = scmp.lt.s32.totalorder %s2234_s25, %s2234_s25 }
 0x5c4   :  { %3201 = vmatpush1.bf16.msra.mxu1 %v3846_v30  ;;  %1670 = vmatprep.mubr.f32.mxu1 %v3684_v1  ;;  %p3648_p10 = scmp.ne.s32.totalorder %s2234_s25, %s3647_s26  ;;  %p3653_p12 = scmp.lt.s32.totalorder %s3647_s26, %s3647_s26 }
 0x5c5   :  { %3203 = vmatprep.subr.bf16.mxu1 %v3849_v31 }
 0x5c6   :  { %p3654_p13 = por %p3653_p12, %p3652_p11 }
 0x5c8   :  { %3205 = vmatpush1.bf16.msra.mxu1 %v3858_v40  ;;  %p3655_p0 = pnand %p3654_p13, %p3648_p10 }
 0x5c9   :  { %3207 = vmatprep.subr.bf16.mxu1 %v3863_v41 }
 0x5cc   :  { %3209 = vmatpush1.bf16.msra.mxu1 %v3873_v50 }
 0x5cd   :  { %v3519_v27 = vpop.eup %3518  ;;  %3211 = vmatprep.subr.bf16.mxu1 %v3876_v53 }
 0x5ce   :  { %v1446_v47 = vmul.f32 %v3519_v27, %v3517_v24  ;;  %v1531_v27 = vpop.permute.xlu1 %1530 }
 0x5d0   :  { %3213 = vmatpush1.bf16.msra.mxu1 %v3881_v59  ;;  %1448 = vst [vmem:[#allocation10 + $0x20] sm:$0xff] %v1446_v47  ;;  %1600 = vmatmul.mubr.f32.vlgmr.msra.gmra.mrb[16].mxu0 %v1446_v47 }
 0x5d1   :  { %3215 = vmatprep.subr.bf16.mxu1 %v3884_v62  ;;  %3232 = vmatpush3.bf16.msra.mxu0 %v3760_v6 }
 0x5d2   :  { %3233 = vmatprep.subr.bf16.mxu0 %v4350_v32  ;;  %2664 = vmatprep.mubr.msk.f32.mxu0 %vm3683_vm0, %v3684_v1 }
 0x5d4   :  { %3217 = vmatpush1.bf16.msra.mxu1 %v3889_v7 }
 0x5d5   :  { %3219 = vmatprep.subr.bf16.mxu1 %v3892_v9  ;;  %3235 = vmatpush3.bf16.msra.mxu0 %v3767_v15 }
 0x5d6   :  { %3236 = vmatprep.subr.bf16.mxu0 %v4350_v32 }
 0x5d8   :  { %3221 = vmatpush1.bf16.msra.mxu1 %v3897_v21 }
 0x5d9   :  { %3223 = vmatprep.subr.bf16.mxu1 %v3900_v22  ;;  %3238 = vmatpush3.bf16.msra.mxu0 %v3780_v28 }
 0x5da   :  { %3239 = vmatprep.subr.bf16.mxu0 %v4350_v32 }
 0x5dc   :  { %3225 = vmatpush1.bf16.msra.mxu1 %v3905_v35 }
 0x5dd   :  { %3227 = vmatprep.subr.bf16.mxu1 %v3908_v36  ;;  %3241 = vmatpush3.bf16.msra.mxu0 %v3790_v37 }
 0x5de   :  { %3242 = vmatprep.subr.bf16.mxu0 %v4350_v32 }
 0x5e0   :  { %3229 = vmatpush1.bf16.msra.mxu1 %v3913_v44 }
 0x5e1   :  { %3255 = vmatprep.subr.bf16.mxu1 %v3762_v10  ;;  %3244 = vmatpush3.bf16.msra.mxu0 %v3800_v46 }
 0x5e2   :  { %3245 = vmatprep.subr.bf16.mxu0 %v4350_v32 }
 0x5e3   :  { %1671 = vmatmul.mubr.f32.vlgmr.msra.gmra.mrb[16].mxu1 %v1446_v47 }
 0x5e4   :  { %3257 = vmatpush1.bf16.msra.mxu1 %v3764_v11  ;;  %1858 = vmatprep.mubr.f32.mxu1 %v3684_v1 }
 0x5e5   :  { %3259 = vmatprep.subr.bf16.mxu1 %v3771_v19  ;;  %3247 = vmatpush3.bf16.msra.mxu0 %v3810_v55 }
 0x5e6   :  { %3248 = vmatprep.subr.bf16.mxu0 %v4350_v32 }
 0x5e8   :  { %3261 = vmatpush1.bf16.msra.mxu1 %v3774_v23 }
 0x5e9   :  { %3263 = vmatprep.subr.bf16.mxu1 %v3777_v25  ;;  %3250 = vmatpush3.bf16.msra.mxu0 %v3820_v2 }
 0x5ea   :  { %3251 = vmatprep.subr.bf16.mxu0 %v4350_v32 }
 0x5ec   :  { %3265 = vmatpush1.bf16.msra.mxu1 %v3784_v33 }
 0x5ed   :  { %3267 = vmatprep.subr.bf16.mxu1 %v3787_v34  ;;  %3253 = vmatpush3.bf16.msra.mxu0 %v3833_v18 }
 0x5ee   :  { %3287 = vmatprep.subr.bf16.mxu0 %v3836_v20 }
 0x5f0   :  { %3269 = vmatpush1.bf16.msra.mxu1 %v3794_v42 }
 0x5f1   :  { %3271 = vmatprep.subr.bf16.mxu1 %v3797_v43 }
 0x5f4   :  { %3273 = vmatpush1.bf16.msra.mxu1 %v3804_v51 }
 0x5f5   :  { %3275 = vmatprep.subr.bf16.mxu1 %v3807_v52 }
 0x5f8   :  { %3277 = vmatpush1.bf16.msra.mxu1 %v3814_v60 }
 0x5f9   :  { %3279 = vmatprep.subr.bf16.mxu1 %v3817_v61 }
 0x5fc   :  { %3281 = vmatpush1.bf16.msra.mxu1 %v3824_v8 }
 0x5fd   :  { %3283 = vmatprep.subr.bf16.mxu1 %v3827_v13 }
 0x600   :  { %3285 = vmatpush1.bf16.msra.mxu1 %v3842_v26 }
 0x601   :  { %3318 = vmatprep.subr.bf16.mxu1 %v4350_v32 }
 0x696   :  { %v1522_v48 = vpop.f32.mrb[14].mxu1 }
 0x697   :  { %v2631_v49 = vpop.f32.mrb[15].mxu1  ;;  %v1523_v4 = vadd.f32 %v4249_v3, %v1522_v48 }
 0x6a3   :  { %v1601_v54 = vpop.f32.mrb[16].mxu0 }
 0x6a4   :  { %v1602_v57 = vadd.f32 %v1601_v54, %v1450_v45  ;;  %v1603_v58 = vpop.f32.mrb[17].mxu0  ;;  %v1452_v54 = vld [vmem:[#allocation4 + $0xb0] sm:$0xff] }
 0x6a5   :  { %v1604_v5 = vadd.f32 %v1603_v58, %v1451_v56 }
 0x6a6   :  { %v2272_v63 = vmul.f32 -1.442695, %v1602_v57 }
 0x6a7   :  { %v2273_v16 = vmul.f32 -1.442695, %v1604_v5 }
 0x6a8   :  { %3520 = vpow2.f32 %v2272_v63 }
 0x6a9   :  { %3522 = vtanh.f32 %v1523_v4 }
 0x6b2   :  { %v3521_v12 = vpop.eup %3520 }
 0x6b3   :  { %v1680_v14 = vadd.f32 1.0, %v3521_v12  ;;  %v3523_v38 = vpop.eup %3522 }
 0x6b4   :  { %v1527_v47 = vsub.f32 %v4190_v39, %v3523_v38  ;;  %v1533_v49 = vmul.f32 %v3523_v38, %v1531_v27 }
 0x6b5   :  { %3524 = vrcp.f32 %v1680_v14 }
 0x6b6   :  { %v1672_v0 = vpop.f32.mrb[16].mxu1  ;;  %3526 = vpow2.f32 %v2273_v16  ;;  %v1534_v57 = vadd.f32 %v1533_v49, %v1527_v47 }
 0x6b7   :  { %v1674_v29 = vpop.f32.mrb[17].mxu1  ;;  %v1673_v48 = vadd.f32 %v1672_v0, %v1452_v54 }
 0x6b8   :  { %v1675_v24 = vadd.f32 %v1674_v29, %v1453_v17 }
 0x6b9   :  { %v2274_v56 = vmul.f32 -1.442695, %v1673_v48 }
 0x6ba   :  { %v2275_v45 = vmul.f32 -1.442695, %v1675_v24 }
 0x6bc   :  { %3528 = vpow2.f32 %v2275_v45 }
 0x6bd   :  { %3530 = vpow2.f32 %v2274_v56 }
 0x6bf   :  { %v3525_v58 = vpop.eup %3524 }
 0x6c0   :  { %v1701_v63 = vmul.f32 %v3525_v58, %v1534_v57  ;;  %v3527_v4 = vpop.eup %3526 }
 0x6c1   :  { %v1686_v5 = vadd.f32 1.0, %v3527_v4 }
 0x6c3   :  { %3532 = vrcp.f32 %v1686_v5 }
 0x6c6   :  { %v3529_v12 = vpop.eup %3528 }
 0x6c7   :  { %v1698_v14 = vadd.f32 1.0, %v3529_v12  ;;  %v3531_v16 = vpop.eup %3530 }
 0x6c8   :  { %v1692_v39 = vadd.f32 1.0, %v3531_v16 }
 0x6c9   :  { %3534 = vrcp.f32 %v1698_v14 }
 0x6ca   :  { %3536 = vrcp.f32 %v1692_v39 }
 0x6cd   :  { %v3533_v17 = vpop.eup %3532 }
 0x6d3   :  { %v3535_v29 = vpop.eup %3534 }
 0x6d4   :  { %v1702_v38 = vmul.f32 %v3535_v29, %v3533_v17  ;;  %v3537_v0 = vpop.eup %3536 }
 0x6d6   :  { %v4253_v24 = vadd.f32 %v1702_v38, %v1701_v63 }
 0x6d8   :  { %3538 = vtanh.f32 %v4253_v24  ;;  %2665 = vmatmul.mubr.f32.vlgmr.msra.gmra.mrb[18].mxu0 %v4253_v24 }
 0x6d9   :  { %3289 = vmatpush1.bf16.msra.mxu0 %v3846_v30  ;;  %1929 = vmatprep.mubr.f32.mxu0 %v3684_v1 }
 0x6da   :  { %3291 = vmatprep.subr.bf16.mxu0 %v3849_v31 }
 0x6dd   :  { %3293 = vmatpush1.bf16.msra.mxu0 %v3858_v40 }
 0x6de   :  { %3295 = vmatprep.subr.bf16.mxu0 %v3863_v41 }
 0x6e1   :  { %3297 = vmatpush1.bf16.msra.mxu0 %v3873_v50 }
 0x6e2   :  { %v3539_v27 = vpop.eup %3538  ;;  %3299 = vmatprep.subr.bf16.mxu0 %v3876_v53 }
 0x6e3   :  { %v1705_v47 = vmul.f32 %v3539_v27, %v3537_v0 }
 0x6e5   :  { %3301 = vmatpush1.bf16.msra.mxu0 %v3881_v59  ;;  %1707 = vst [vmem:[#allocation10 + $0x28] sm:$0xff] %v1705_v47  ;;  %1859 = vmatmul.mubr.f32.vlgmr.msra.gmra.mrb[18].mxu1 %v1705_v47 }
 0x6e6   :  { %3303 = vmatprep.subr.bf16.mxu0 %v3884_v62  ;;  %3320 = vmatpush3.bf16.msra.mxu1 %v3760_v6 }
 0x6e7   :  { %3321 = vmatprep.subr.bf16.mxu1 %v4350_v32  ;;  %2699 = vmatprep.mubr.msk.f32.mxu1 %vm3683_vm0, %v3684_v1 }
 0x6e9   :  { %3305 = vmatpush1.bf16.msra.mxu0 %v3889_v7 }
 0x6ea   :  { %3307 = vmatprep.subr.bf16.mxu0 %v3892_v9  ;;  %3323 = vmatpush3.bf16.msra.mxu1 %v3767_v15 }
 0x6eb   :  { %3324 = vmatprep.subr.bf16.mxu1 %v4350_v32 }
 0x6ed   :  { %3309 = vmatpush1.bf16.msra.mxu0 %v3897_v21 }
 0x6ee   :  { %3311 = vmatprep.subr.bf16.mxu0 %v3900_v22  ;;  %3326 = vmatpush3.bf16.msra.mxu1 %v3780_v28 }
 0x6ef   :  { %3327 = vmatprep.subr.bf16.mxu1 %v4350_v32 }
 0x6f1   :  { %3313 = vmatpush1.bf16.msra.mxu0 %v3905_v35 }
 0x6f2   :  { %3315 = vmatprep.subr.bf16.mxu0 %v3908_v36  ;;  %3329 = vmatpush3.bf16.msra.mxu1 %v3790_v37 }
 0x6f3   :  { %3330 = vmatprep.subr.bf16.mxu1 %v4350_v32 }
 0x6f5   :  { %3317 = vmatpush1.bf16.msra.mxu0 %v3913_v44 }
 0x6f6   :  { %3343 = vmatprep.subr.bf16.mxu0 %v3762_v10  ;;  %3332 = vmatpush3.bf16.msra.mxu1 %v3800_v46  ;;  %v1712_v46 = vld [vmem:[#allocation4 + $0xd8] sm:$0xff] }
 0x6f7   :  { %3333 = vmatprep.subr.bf16.mxu1 %v4350_v32 }
 0x6f8   :  { %1930 = vmatmul.mubr.f32.vlgmr.msra.gmra.mrb[20].mxu0 %v1705_v47 }
 0x6f9   :  { %3345 = vmatpush1.bf16.msra.mxu0 %v3764_v11  ;;  %2117 = vmatprep.mubr.f32.mxu0 %v3684_v1  ;;  %v1709_v11 = vld [vmem:[#allocation4 + $0xc0] sm:$0xff] }
 0x6fa   :  { %3347 = vmatprep.subr.bf16.mxu0 %v3771_v19  ;;  %3335 = vmatpush3.bf16.msra.mxu1 %v3810_v55 }
 0x6fb   :  { %3336 = vmatprep.subr.bf16.mxu1 %v4350_v32 }
 0x6fd   :  { %3349 = vmatpush1.bf16.msra.mxu0 %v3774_v23 }
 0x6fe   :  { %3351 = vmatprep.subr.bf16.mxu0 %v3777_v25  ;;  %3338 = vmatpush3.bf16.msra.mxu1 %v3820_v2 }
 0x6ff   :  { %3339 = vmatprep.subr.bf16.mxu1 %v4350_v32 }
 0x701   :  { %3353 = vmatpush1.bf16.msra.mxu0 %v3784_v33  ;;  %v1710_v33 = vld [vmem:[#allocation4 + $0xc8] sm:$0xff] }
 0x702   :  { %3355 = vmatprep.subr.bf16.mxu0 %v3787_v34  ;;  %3341 = vmatpush3.bf16.msra.mxu1 %v3833_v18  ;;  %v1711_v18 = vld [vmem:[#allocation4 + $0xd0] sm:$0xff] }
 0x703   :  { %3375 = vmatprep.subr.bf16.mxu1 %v3836_v20 }
 0x705   :  { %3357 = vmatpush1.bf16.msra.mxu0 %v3794_v42 }
 0x706   :  { %3359 = vmatprep.subr.bf16.mxu0 %v3797_v43 }
 0x709   :  { %3361 = vmatpush1.bf16.msra.mxu0 %v3804_v51 }
 0x70a   :  { %3363 = vmatprep.subr.bf16.mxu0 %v3807_v52 }
 0x70d   :  { %3365 = vmatpush1.bf16.msra.mxu0 %v3814_v60 }
 0x70e   :  { %3367 = vmatprep.subr.bf16.mxu0 %v3817_v61  ;;  %v1790_v61 = vpop.permute.xlu0 %1789 }
 0x711   :  { %3369 = vmatpush1.bf16.msra.mxu0 %v3824_v8 }
 0x712   :  { %3371 = vmatprep.subr.bf16.mxu0 %v3827_v13 }
 0x715   :  { %3373 = vmatpush1.bf16.msra.mxu0 %v3842_v26 }
 0x7ab   :  { %v1781_v6 = vpop.f32.mrb[18].mxu0 }
 0x7ac   :  { %v2666_v10 = vpop.f32.mrb[19].mxu0  ;;  %v1782_v28 = vadd.f32 %v4249_v3, %v1781_v6  ;;  %v1970_v6 = vld [vmem:[#allocation4 + $0xf0] sm:$0xff] }
 0x7b8   :  { %v1860_v15 = vpop.f32.mrb[18].mxu1 }
 0x7b9   :  { %v1861_v19 = vadd.f32 %v1860_v15, %v1709_v11  ;;  %v1862_v23 = vpop.f32.mrb[19].mxu1 }
 0x7ba   :  { %v1863_v34 = vadd.f32 %v1862_v23, %v1710_v33 }
 0x7bb   :  { %v2277_v25 = vmul.f32 -1.442695, %v1861_v19 }
 0x7bc   :  { %v2278_v43 = vmul.f32 -1.442695, %v1863_v34 }
 0x7bd   :  { %3540 = vpow2.f32 %v2277_v25 }
 0x7be   :  { %3542 = vtanh.f32 %v1782_v28 }
 0x7c7   :  { %v3541_v37 = vpop.eup %3540 }
 0x7c8   :  { %v1939_v42 = vadd.f32 1.0, %v3541_v37  ;;  %v3543_v52 = vpop.eup %3542 }
 0x7c9   :  { %v1786_v2 = vsub.f32 %v4253_v24, %v3543_v52  ;;  %v1792_v8 = vmul.f32 %v3543_v52, %v1790_v61  ;;  %v2049_v24 = vpop.permute.xlu1 %2048 }
 0x7ca   :  { %3544 = vrcp.f32 %v1939_v42 }
 0x7cb   :  { %v1931_v51 = vpop.f32.mrb[20].mxu0  ;;  %3546 = vpow2.f32 %v2278_v43  ;;  %v1793_v26 = vadd.f32 %v1792_v8, %v1786_v2 }
 0x7cc   :  { %v1933_v55 = vpop.f32.mrb[21].mxu0  ;;  %v1932_v20 = vadd.f32 %v1931_v51, %v1711_v18 }
 0x7cd   :  { %v1934_v60 = vadd.f32 %v1933_v55, %v1712_v46 }
 0x7ce   :  { %v2279_v54 = vmul.f32 -1.442695, %v1932_v20 }
 0x7cf   :  { %v2280_v13 = vmul.f32 -1.442695, %v1934_v60 }
 0x7d1   :  { %3548 = vpow2.f32 %v2280_v13 }
 0x7d2   :  { %3550 = vpow2.f32 %v2279_v54 }
 0x7d4   :  { %v3545_v32 = vpop.eup %3544 }
 0x7d5   :  { %v1960_v49 = vmul.f32 %v3545_v32, %v1793_v26  ;;  %v3547_v45 = vpop.eup %3546 }
 0x7d6   :  { %v1945_v48 = vadd.f32 1.0, %v3547_v45 }
 0x7d8   :  { %3552 = vrcp.f32 %v1945_v48 }
 0x7db   :  { %v3549_v57 = vpop.eup %3548 }
 0x7dc   :  { %v1957_v58 = vadd.f32 1.0, %v3549_v57  ;;  %v3551_v63 = vpop.eup %3550 }
 0x7dd   :  { %v1951_v5 = vadd.f32 1.0, %v3551_v63 }
 0x7de   :  { %3554 = vrcp.f32 %v1957_v58 }
 0x7df   :  { %3556 = vrcp.f32 %v1951_v5 }
 0x7e2   :  { %v3553_v4 = vpop.eup %3552 }
 0x7e8   :  { %v3555_v56 = vpop.eup %3554 }
 0x7e9   :  { %v1961_v12 = vmul.f32 %v3555_v56, %v3553_v4  ;;  %v3557_v16 = vpop.eup %3556 }
 0x7eb   :  { %v1962_v14 = vadd.f32 %v1961_v12, %v1960_v49 }
 0x7ed   :  { %3558 = vtanh.f32 %v1962_v14  ;;  %2700 = vmatmul.mubr.f32.vlgmr.msra.gmra.mrb[20].mxu1 %v1962_v14 }
 0x7ee   :  { %3377 = vmatpush1.bf16.msra.mxu1 %v3846_v30  ;;  %2188 = vmatprep.mubr.f32.mxu1 %v3684_v1 }
 0x7ef   :  { %3379 = vmatprep.subr.bf16.mxu1 %v3849_v31  ;;  %v1968_v31 = vld [vmem:[#allocation4 + $0xe0] sm:$0xff] }
 0x7f2   :  { %3381 = vmatpush1.bf16.msra.mxu1 %v3858_v40 }
 0x7f3   :  { %3383 = vmatprep.subr.bf16.mxu1 %v3863_v41 }
 0x7f6   :  { %3385 = vmatpush1.bf16.msra.mxu1 %v3873_v50 }
 0x7f7   :  { %v3559_v17 = vpop.eup %3558  ;;  %3387 = vmatprep.subr.bf16.mxu1 %v3876_v53 }
 0x7f8   :  { %v1964_v29 = vmul.f32 %v3559_v17, %v3557_v16 }
 0x7fa   :  { %3389 = vmatpush1.bf16.msra.mxu1 %v3881_v59  ;;  %1966 = vst [vmem:[#allocation10 + $0x30] sm:$0xff] %v1964_v29  ;;  %2118 = vmatmul.mubr.f32.vlgmr.msra.gmra.mrb[22].mxu0 %v1964_v29 }
 0x7fb   :  { %3391 = vmatprep.subr.bf16.mxu1 %v3884_v62  ;;  %v1969_v62 = vld [vmem:[#allocation4 + $0xe8] sm:$0xff] }
 0x7fe   :  { %3393 = vmatpush1.bf16.msra.mxu1 %v3889_v7 }
 0x7ff   :  { %3395 = vmatprep.subr.bf16.mxu1 %v3892_v9 }
 0x802   :  { %3397 = vmatpush1.bf16.msra.mxu1 %v3897_v21 }
 0x803   :  { %3399 = vmatprep.subr.bf16.mxu1 %v3900_v22 }
 0x806   :  { %3401 = vmatpush1.bf16.msra.mxu1 %v3905_v35  ;;  %v1971_v35 = vld [vmem:[#allocation4 + $0xf8] sm:$0xff] }
 0x807   :  { %3403 = vmatprep.subr.bf16.mxu1 %v3908_v36 }
 0x80a   :  { %3405 = vmatpush1.bf16.msra.mxu1 %v3913_v44 }
 0x80d   :  { %2189 = vmatmul.mubr.f32.vlgmr.msra.gmra.mrb[22].mxu1 %v1964_v29 }
 0x8c0   :  { %v2040_v1 = vpop.f32.mrb[20].mxu1 }
 0x8c1   :  { %v2701_v30 = vpop.f32.mrb[21].mxu1  ;;  %v2041_v59 = vadd.f32 %v4249_v3, %v2040_v1 }
 0x8cd   :  { %v2119_v40 = vpop.f32.mrb[22].mxu0 }
 0x8ce   :  { %v2120_v41 = vadd.f32 %v2119_v40, %v1968_v31  ;;  %v2121_v50 = vpop.f32.mrb[23].mxu0 }
 0x8cf   :  { %v2122_v7 = vadd.f32 %v2121_v50, %v1969_v62 }
 0x8d0   :  { %v2282_v53 = vmul.f32 -1.442695, %v2120_v41 }
 0x8d1   :  { %v2283_v22 = vmul.f32 -1.442695, %v2122_v7 }
 0x8d2   :  { %3560 = vpow2.f32 %v2282_v53 }
 0x8d3   :  { %3562 = vtanh.f32 %v2041_v59 }
 0x8dc   :  { %v3561_v9 = vpop.eup %3560 }
 0x8dd   :  { %v2198_v21 = vadd.f32 1.0, %v3561_v9  ;;  %v3563_v44 = vpop.eup %3562 }
 0x8de   :  { %v2045_v0 = vsub.f32 %v1962_v14, %v3563_v44  ;;  %v2051_v27 = vmul.f32 %v3563_v44, %v2049_v24 }
 0x8df   :  { %3564 = vrcp.f32 %v2198_v21 }
 0x8e0   :  { %v2190_v36 = vpop.f32.mrb[22].mxu1  ;;  %3566 = vpow2.f32 %v2283_v22  ;;  %v2052_v3 = vadd.f32 %v2051_v27, %v2045_v0 }
 0x8e1   :  { %v2192_v39 = vpop.f32.mrb[23].mxu1  ;;  %v2191_v10 = vadd.f32 %v2190_v36, %v1970_v6 }
 0x8e2   :  { %v2193_v38 = vadd.f32 %v2192_v39, %v1971_v35 }
 0x8e3   :  { %v2284_v23 = vmul.f32 -1.442695, %v2191_v10 }
 0x8e4   :  { %v2285_v47 = vmul.f32 -1.442695, %v2193_v38 }
 0x8e6   :  { %3568 = vpow2.f32 %v2285_v47 }
 0x8e7   :  { %3570 = vpow2.f32 %v2284_v23 }
 0x8e9   :  { %v3565_v11 = vpop.eup %3564 }
 0x8ea   :  { %v2219_v15 = vmul.f32 %v3565_v11, %v2052_v3  ;;  %v3567_v19 = vpop.eup %3566 }
 0x8eb   :  { %v2204_v25 = vadd.f32 1.0, %v3567_v19 }
 0x8ed   :  { %3572 = vrcp.f32 %v2204_v25 }
 0x8f0   :  { %v3569_v28 = vpop.eup %3568 }
 0x8f1   :  { %v2216_v33 = vadd.f32 1.0, %v3569_v28  ;;  %v3571_v34 = vpop.eup %3570 }
 0x8f2   :  { %v2210_v43 = vadd.f32 1.0, %v3571_v34 }
 0x8f3   :  { %3574 = vrcp.f32 %v2216_v33 }
 0x8f4   :  { %3576 = vrcp.f32 %v2210_v43 }
 0x8f7   :  { %v3573_v37 = vpop.eup %3572 }
 0x8fd   :  { %v3575_v42 = vpop.eup %3574 }
 0x8fe   :  { %v2220_v46 = vmul.f32 %v3575_v42, %v3573_v37  ;;  %v3577_v52 = vpop.eup %3576 }
 0x900   :  { %v2221_v51 = vadd.f32 %v2220_v46, %v2219_v15 }
 0x902   :  { %3578 = vtanh.f32 %v2221_v51 }
 0x90c   :  { %v3579_v55 = vpop.eup %3578 }
 0x90d   :  { %v2223_v60 = vmul.f32 %v3579_v55, %v3577_v52 }
 0x90f   :  { %2225 = vst [vmem:[#allocation10 + $0x38] sm:$0xff] %v2223_v60 }
 0x910   :  { %3658 = shalt.err (!%p3655_p0)
}
 0x911   :  { %s3659_s6 = scalar_lea.hbm %s4347_s5, 1024 }
 0x912   :  { %p3660_p1 = scmp.ne.s32.totalorder %s4347_s5, %s3659_s6  ;;  %p3663_p2 = scmp.lt.u32.totalorder %s3659_s6, %s4347_s5 }
 0x914   :  { %p3665_p3 = pnand %p3663_p2, %p3660_p1 }
 0x916   :  { %3668 = shalt.err (!%p3665_p3)
}
 0x917   :  { %2239 = dma.vmem_to_hbm [thread:$0]  %s2234_s25, 1024, %s4347_s5, [#allocation6], %s3676_s28, %s3676_s28, %s3677_s29  }
 0x918   :  { %3673 = dma.done.wait [#allocation6], 1024  }
 0x919   :  { %3674 = vsyncadd [#allocation6], 4294966272 }
 0x91a   :  { %2243 = vsyncpa [#allocation5], 1 }
 0x91b   :  { %2244 = vsyncpa [#allocation8], 1 }
 0x91c   :  { %2245 = vsyncpa [#allocation6], 1 }

</bundles_post_ra>
